<compile_context>
chip_gen: v6e
topology: v6e:2x2x1
jax: 0.10.0
libtpu: 0.0.40
codegen_flags: <defaults>
</compile_context>

<pallas_src>
import math
import functools

import jax
import jax.numpy as jnp
from jax.experimental import pallas as pl
from jax.experimental.pallas import tpu as pltpu


# ------------------------- small helpers -----------------------------------

_CompilerParams = getattr(pltpu, "CompilerParams", None) or getattr(
    pltpu, "TPUCompilerParams", None)


def _cparams(n_parallel):
    """dimension_semantics=('parallel',)*n — lets v7x shard the grid over 2 TCs."""
    if _CompilerParams is None:
        return None
    return _CompilerParams(dimension_semantics=("parallel",) * n_parallel)


def _pick_tile(m):
    """Largest MXU-friendly row tile that evenly divides m (full block if tiny)."""
    for t in (512, 256, 128):
        if m % t == 0:
            return t
    return m


# ----------------------------- Pallas kernels -------------------------------

def _linear_kernel(x_ref, w_ref, b_ref, o_ref, *, relu):
    x = x_ref[...].astype(jnp.bfloat16)
    w = w_ref[...]                               # already bf16
    y = jnp.dot(x, w, preferred_element_type=jnp.float32) + b_ref[...]
    if relu:
        y = jnp.maximum(y, 0.0)
    o_ref[...] = y


def linear(x2d, w, b, relu=False):
    """x2d (M,K) @ w (K,N) + b (N,), tiled over M with double-buffered blocks."""
    M, K = x2d.shape
    N = w.shape[1]
    tm = _pick_tile(M)
    return pl.pallas_call(
        functools.partial(_linear_kernel, relu=relu),
        out_shape=jax.ShapeDtypeStruct((M, N), jnp.float32),
        grid=(M // tm,),
        in_specs=[pl.BlockSpec((tm, K), lambda i: (i, 0)),
                  pl.BlockSpec((K, N), lambda i: (0, 0)),
                  pl.BlockSpec((1, N), lambda i: (0, 0))],
        out_specs=pl.BlockSpec((tm, N), lambda i: (i, 0)),
        compiler_params=_cparams(1),
    )(x2d, w, b.reshape(1, N))


def _mlp_head_kernel(x_ref, w1_ref, b1_ref, w2_ref, b2_ref, o_ref):
    x = x_ref[...].astype(jnp.bfloat16)
    h = jnp.dot(x, w1_ref[...], preferred_element_type=jnp.float32) + b1_ref[...]
    # dropout: identity (inference)
    o_ref[...] = jnp.dot(h.astype(jnp.bfloat16), w2_ref[...],
                         preferred_element_type=jnp.float32) + b2_ref[...]


def mlp_head(x2d, w1, b1, w2, b2):
    """Fused MLP1 -> MLP2 (intermediate stays in VMEM), tiled over M rows."""
    M, H = x2d.shape
    O = w2.shape[1]
    tm = _pick_tile(M)
    return pl.pallas_call(
        _mlp_head_kernel,
        out_shape=jax.ShapeDtypeStruct((M, O), jnp.float32),
        grid=(M // tm,),
        in_specs=[pl.BlockSpec((tm, H), lambda i: (i, 0)),
                  pl.BlockSpec((H, H), lambda i: (0, 0)),
                  pl.BlockSpec((1, H), lambda i: (0, 0)),
                  pl.BlockSpec((H, O), lambda i: (0, 0)),
                  pl.BlockSpec((1, O), lambda i: (0, 0))],
        out_specs=pl.BlockSpec((tm, O), lambda i: (i, 0)),
        compiler_params=_cparams(1),
    )(x2d, w1, b1.reshape(1, H), w2, b2.reshape(1, O))


def _attn_block_kernel(qkv_ref, x_ref, wo_ref, bo_ref, g_ref, b_ref, o_ref,
                       *, nhead, scale, eps):
    """Per-batch MHA + out-proj + residual + LayerNorm1 (post-norm)."""
    _, N, H3 = qkv_ref.shape
    H = H3 // 3
    dh = H // nhead
    qkv = qkv_ref[0]                             # (N, 3H) f32
    x = x_ref[0]                                 # (N, H)  f32

    heads = []
    for hidx in range(nhead):                    # unrolled, nhead is static/small
        q = qkv[:, hidx * dh:(hidx + 1) * dh].astype(jnp.bfloat16)
        k = qkv[:, H + hidx * dh: H + (hidx + 1) * dh].astype(jnp.bfloat16)
        v = qkv[:, 2 * H + hidx * dh: 2 * H + (hidx + 1) * dh].astype(jnp.bfloat16)
        s = jnp.dot(q, k.T, preferred_element_type=jnp.float32) * scale
        s = s - jnp.max(s, axis=-1, keepdims=True)
        p = jnp.exp(s)                           # f32 softmax statistics
        p = p / jnp.sum(p, axis=-1, keepdims=True)
        heads.append(jnp.dot(p.astype(jnp.bfloat16), v,
                             preferred_element_type=jnp.float32))
    attn = jnp.concatenate(heads, axis=-1)       # (N, H)

    attn = jnp.dot(attn.astype(jnp.bfloat16), wo_ref[...],
                   preferred_element_type=jnp.float32) + bo_ref[...]
    # dropout1: identity (inference)
    y = x + attn                                 # fused residual
    mu = jnp.mean(y, axis=-1, keepdims=True)
    var = jnp.mean((y - mu) ** 2, axis=-1, keepdims=True)
    o_ref[0] = (y - mu) * jax.lax.rsqrt(var + eps) * g_ref[...] + b_ref[...]


def attn_block(qkv, x, wo, bo, g, b, nhead, eps=1e-5):
    """qkv (B,N,3H), x (B,N,H) -> LN1(x + out_proj(MHA(qkv)))."""
    B, N, H = x.shape
    scale = 1.0 / math.sqrt(H // nhead)
    # TODO(synk): for large N, flash-tile the KV axis with an online-softmax
    # accumulator and pack heads into the lane dimension instead of full (N,N).
    return pl.pallas_call(
        functools.partial(_attn_block_kernel, nhead=nhead, scale=scale, eps=eps),
        out_shape=jax.ShapeDtypeStruct((B, N, H), jnp.float32),
        grid=(B,),
        in_specs=[pl.BlockSpec((1, N, 3 * H), lambda i: (i, 0, 0)),
                  pl.BlockSpec((1, N, H), lambda i: (i, 0, 0)),
                  pl.BlockSpec((H, H), lambda i: (0, 0)),
                  pl.BlockSpec((1, H), lambda i: (0, 0)),
                  pl.BlockSpec((1, H), lambda i: (0, 0)),
                  pl.BlockSpec((1, H), lambda i: (0, 0))],
        out_specs=pl.BlockSpec((1, N, H), lambda i: (i, 0, 0)),
        compiler_params=_cparams(1),
    )(qkv, x, wo, bo.reshape(1, H), g.reshape(1, H), b.reshape(1, H))


def _leff_kernel(h_ref, w1_ref, b1_ref, cw_ref, cb_ref, w2_ref, b2_ref,
                 g_ref, bt_ref, o_ref, *, eps):
    """Per-batch LeFF (lin1+ReLU -> conv1d k=3 -> ReLU -> lin2) + residual + LN2."""
    x = h_ref[0]                                 # (N, H) f32
    N, H = x.shape

    t = jnp.dot(x.astype(jnp.bfloat16), w1_ref[...],
                preferred_element_type=jnp.float32) + b1_ref[...]
    t = jnp.maximum(t, 0.0)
    # dropout: identity (inference)

    # "same" conv, kernel 3, padding 1: boundary taps zero-padded in-kernel.
    zero = jnp.zeros((1, H), jnp.float32)
    t_prev = jnp.concatenate([zero, t[:-1, :]], axis=0)   # row n -> t[n-1]
    t_next = jnp.concatenate([t[1:, :], zero], axis=0)    # row n -> t[n+1]
    cw = cw_ref[...]                                      # (3, H, H) bf16
    c = (jnp.dot(t_prev.astype(jnp.bfloat16), cw[0], preferred_element_type=jnp.float32)
         + jnp.dot(t.astype(jnp.bfloat16), cw[1], preferred_element_type=jnp.float32)
         + jnp.dot(t_next.astype(jnp.bfloat16), cw[2], preferred_element_type=jnp.float32)
         + cb_ref[...])
    c = jnp.maximum(c, 0.0)

    f = jnp.dot(c.astype(jnp.bfloat16), w2_ref[...],
                preferred_element_type=jnp.float32) + b2_ref[...]
    # dropout2: identity (inference)
    y = x + f                                    # fused residual
    mu = jnp.mean(y, axis=-1, keepdims=True)
    var = jnp.mean((y - mu) ** 2, axis=-1, keepdims=True)
    o_ref[0] = (y - mu) * jax.lax.rsqrt(var + eps) * g_ref[...] + bt_ref[...]


def leff_block(h, w1, b1, cw, cb, w2, b2, g, bt, eps=1e-5):
    B, N, H = h.shape
    # TODO(synk): for large N, tile the sequence axis with a 1-row halo instead
    # of one full-sequence block per batch.
    return pl.pallas_call(
        functools.partial(_leff_kernel, eps=eps),
        out_shape=jax.ShapeDtypeStruct((B, N, H), jnp.float32),
        grid=(B,),
        in_specs=[pl.BlockSpec((1, N, H), lambda i: (i, 0, 0)),
                  pl.BlockSpec((H, H), lambda i: (0, 0)),
                  pl.BlockSpec((1, H), lambda i: (0, 0)),
                  pl.BlockSpec((3, H, H), lambda i: (0, 0, 0)),
                  pl.BlockSpec((1, H), lambda i: (0, 0)),
                  pl.BlockSpec((H, H), lambda i: (0, 0)),
                  pl.BlockSpec((1, H), lambda i: (0, 0)),
                  pl.BlockSpec((1, H), lambda i: (0, 0)),
                  pl.BlockSpec((1, H), lambda i: (0, 0))],
        out_specs=pl.BlockSpec((1, N, H), lambda i: (i, 0, 0)),
        compiler_params=_cparams(1),
    )(h, w1, b1.reshape(1, H), cw, cb.reshape(1, H),
      w2, b2.reshape(1, H), g.reshape(1, H), bt.reshape(1, H))


def _peg_kernel(x_ref, w_ref, b_ref, o_ref):
    """Depthwise Conv1d (groups=C, k=3, pad=1) + residual, halo handled in-kernel."""
    x = x_ref[0]                                 # (N, C) f32
    _, C = x.shape
    zero = jnp.zeros((1, C), jnp.float32)
    x_prev = jnp.concatenate([zero, x[:-1, :]], axis=0)
    x_next = jnp.concatenate([x[1:, :], zero], axis=0)
    w = w_ref[...]                               # (3, C) f32 (VPU math stays f32)
    o_ref[0] = (x_prev * w[0:1, :] + x * w[1:2, :] + x_next * w[2:3, :]
                + b_ref[...] + x)                # PEG residual (s == 1)


def peg(x, w, b):
    B, N, C = x.shape
    return pl.pallas_call(
        _peg_kernel,
        out_shape=jax.ShapeDtypeStruct((B, N, C), jnp.float32),
        grid=(B,),
        in_specs=[pl.BlockSpec((1, N, C), lambda i: (i, 0, 0)),
                  pl.BlockSpec((3, C), lambda i: (0, 0)),
                  pl.BlockSpec((1, C), lambda i: (0, 0))],
        out_specs=pl.BlockSpec((1, N, C), lambda i: (i, 0, 0)),
        compiler_params=_cparams(1),
    )(x, w, b.reshape(1, C))


# --------------------------- model composition ------------------------------

def encoder_layer_fwd(x, p, nhead):
    """LeTransformerEncoderLayer (norm_first=False, batch_first=True)."""
    B, N, H = x.shape
    # fused QKV projection (one HBM read of x, lane-dense 3H output)
    qkv = linear(x.reshape(B * N, H), p['wqkv'], p['bqkv']).reshape(B, N, 3 * H)
    # attention + out-proj + residual + LN1 fused
    h = attn_block(qkv, x, p['wo'], p['bo'], p['ln1_g'], p['ln1_b'], nhead)
    # LeFF + residual + LN2 fused
    return leff_block(h, p['w1'], p['b1'], p['conv_w'], p['conv_b'],
                      p['w2'], p['b2'], p['ln2_g'], p['ln2_b'])


def octformer_fwd(params, features, nhead):
    B, N, Fin = features.shape
    H = params['emb_w'].shape[1]
    x = linear(features.reshape(B * N, Fin),
               params['emb_w'], params['emb_b']).reshape(B, N, H)
    # absolute_pos == 'False' in the reference config -> no learned abs. pos embedding
    x = peg(x, params['peg_w'], params['peg_b'])      # pos_block before layer 0
    for p in params['layers']:
        x = encoder_layer_fwd(x, p, nhead)
    y = mlp_head(x.reshape(B * N, H),
                 params['mlp1_w'], params['mlp1_b'],
                 params['mlp2_w'], params['mlp2_b'])
    return y.reshape(B, N, -1)


# ------------------------------ param init ----------------------------------

def init_params(key, hidden, num_layers, out_dim=256):
    keys = iter(jax.random.split(key, 8 + num_layers * 12))

    def nrm(shape, scale=0.05, dtype=jnp.float32):
        return (scale * jax.random.normal(next(keys), shape, jnp.float32)).astype(dtype)

    bf = jnp.bfloat16   # weight matrices live in bf16 (MXU inputs)
    params = {
        'emb_w': nrm((6, hidden), dtype=bf),          'emb_b': nrm((hidden,)),
        'peg_w': nrm((3, hidden)),                    'peg_b': nrm((hidden,)),
        'mlp1_w': nrm((hidden, hidden), dtype=bf),    'mlp1_b': nrm((hidden,)),
        'mlp2_w': nrm((hidden, out_dim), dtype=bf),   'mlp2_b': nrm((out_dim,)),
        'layers': [],
    }
    for _ in range(num_layers):
        params['layers'].append({
            'wqkv': nrm((hidden, 3 * hidden), dtype=bf), 'bqkv': nrm((3 * hidden,)),
            'wo': nrm((hidden, hidden), dtype=bf),       'bo': nrm((hidden,)),
            'ln1_g': jnp.ones((hidden,), jnp.float32),
            'ln1_b': jnp.zeros((hidden,), jnp.float32),
            'w1': nrm((hidden, hidden), dtype=bf),       'b1': nrm((hidden,)),
            'conv_w': nrm((3, hidden, hidden), dtype=bf), 'conv_b': nrm((hidden,)),
            'w2': nrm((hidden, hidden), dtype=bf),       'b2': nrm((hidden,)),
            'ln2_g': jnp.ones((hidden,), jnp.float32),
            'ln2_b': jnp.zeros((hidden,), jnp.float32),
        })
    return params


# ---------------------------------- main -------------------------------------

if __name__ == "__main__":
    B, N, HIDDEN, NHEAD, NUM_LAYERS = 2, 8, 32, 4, 2

    key = jax.random.PRNGKey(0)
    pkey, xkey = jax.random.split(key)
    params = init_params(pkey, HIDDEN, NUM_LAYERS)
    features = jax.random.normal(xkey, (B, N, 6), jnp.float32)

    fwd = jax.jit(functools.partial(octformer_fwd, nhead=NHEAD))
    out = fwd(params, features)
    jax.block_until_ready(out)

    assert out.shape == (B, N, 256), out.shape
    assert bool(jnp.all(jnp.isfinite(out)))
    print("KERNEL_OK")
</pallas_src>

<mosaic_0001>
module attributes {stable_mosaic.version = 11 : i64} {
  func.func @_linear_kernel(%arg0: i32, %arg1: memref<16x32xf32, #tpu.memory_space<vmem>>, %arg2: memref<32x96xbf16, #tpu.memory_space<vmem>>, %arg3: memref<1x96xf32, #tpu.memory_space<vmem>>, %arg4: memref<16x96xf32, #tpu.memory_space<vmem>>) attributes {dimension_semantics = [#tpu.dimension_semantics<parallel>], iteration_bounds = array<i64: 1>, scalar_prefetch = 0 : i64, scratch_operands = 0 : i64, tpu.core_type = #tpu.core_type<tc>, window_params = [{transform_indices = @transform_0, window_bounds = array<i64: 16, 32>}, {pipeline_mode = #tpu.pipeline_mode<synchronous>, transform_indices = @transform_1, window_bounds = array<i64: 32, 96>}, {pipeline_mode = #tpu.pipeline_mode<synchronous>, transform_indices = @transform_2, window_bounds = array<i64: 1, 96>}, {transform_indices = @transform_3, window_bounds = array<i64: 16, 96>}]} {
    %c0 = arith.constant 0 : index
    %c0_0 = arith.constant 0 : index
    %0 = vector.load %arg1[%c0, %c0_0] : memref<16x32xf32, #tpu.memory_space<vmem>>, vector<16x32xf32>
    %1 = arith.truncf %0 : vector<16x32xf32> to vector<16x32xbf16>
    %c0_1 = arith.constant 0 : index
    %c0_2 = arith.constant 0 : index
    %2 = vector.load %arg2[%c0_1, %c0_2] : memref<32x96xbf16, #tpu.memory_space<vmem>>, vector<32x96xbf16>
    %cst = arith.constant dense<0.000000e+00> : vector<16x96xf32>
    %3 = tpu.matmul %1, %2, %cst {dimension_numbers = #tpu.dot_dimension_numbers<[1], [0], [0], [1], [0, 0, 1, 1], [], []>} : vector<16x32xbf16>, vector<32x96xbf16>, vector<16x96xf32> -> vector<16x96xf32>
    %c0_3 = arith.constant 0 : index
    %c0_4 = arith.constant 0 : index
    %4 = vector.load %arg3[%c0_3, %c0_4] : memref<1x96xf32, #tpu.memory_space<vmem>>, vector<1x96xf32>
    %5 = vector.broadcast %4 : vector<1x96xf32> to vector<16x96xf32>
    %6 = arith.addf %3, %5 : vector<16x96xf32>
    %c0_5 = arith.constant 0 : index
    %c0_6 = arith.constant 0 : index
    %7 = vector.load %arg4[%c0_5, %c0_6] : memref<16x96xf32, #tpu.memory_space<vmem>>, vector<16x96xf32>
    tpu.vector_store %arg4[%c0_5, %c0_6], %6 {strides = array<i32>} : memref<16x96xf32, #tpu.memory_space<vmem>>, vector<16x96xf32>,
    return
  }
  func.func @transform_0(%arg0: i32) -> (i32, i32) {
    %c0_i32 = arith.constant 0 : i32
    %c0_i32_0 = arith.constant 0 : i32
    return %arg0, %c0_i32 : i32, i32
  }
  func.func @transform_1(%arg0: i32) -> (i32, i32) {
    %c0_i32 = arith.constant 0 : i32
    %c0_i32_0 = arith.constant 0 : i32
    %c0_i32_1 = arith.constant 0 : i32
    return %c0_i32, %c0_i32_0 : i32, i32
  }
  func.func @transform_2(%arg0: i32) -> (i32, i32) {
    %c0_i32 = arith.constant 0 : i32
    %c0_i32_0 = arith.constant 0 : i32
    %c0_i32_1 = arith.constant 0 : i32
    return %c0_i32, %c0_i32_0 : i32, i32
  }
  func.func @transform_3(%arg0: i32) -> (i32, i32) {
    %c0_i32 = arith.constant 0 : i32
    %c0_i32_0 = arith.constant 0 : i32
    return %arg0, %c0_i32 : i32, i32
  }
}

module attributes {stable_mosaic.version = 11 : i64} {
  func.func @_linear_kernel(%arg0: i32, %arg1: memref<16x6xf32, #tpu.memory_space<vmem>>, %arg2: memref<6x32xbf16, #tpu.memory_space<vmem>>, %arg3: memref<1x32xf32, #tpu.memory_space<vmem>>, %arg4: memref<16x32xf32, #tpu.memory_space<vmem>>) attributes {dimension_semantics = [#tpu.dimension_semantics<parallel>], iteration_bounds = array<i64: 1>, scalar_prefetch = 0 : i64, scratch_operands = 0 : i64, tpu.core_type = #tpu.core_type<tc>, window_params = [{transform_indices = @transform_0, window_bounds = array<i64: 16, 6>}, {pipeline_mode = #tpu.pipeline_mode<synchronous>, transform_indices = @transform_1, window_bounds = array<i64: 6, 32>}, {pipeline_mode = #tpu.pipeline_mode<synchronous>, transform_indices = @transform_2, window_bounds = array<i64: 1, 32>}, {transform_indices = @transform_3, window_bounds = array<i64: 16, 32>}]} {
    %c0 = arith.constant 0 : index
    %c0_0 = arith.constant 0 : index
    %0 = vector.load %arg1[%c0, %c0_0] : memref<16x6xf32, #tpu.memory_space<vmem>>, vector<16x6xf32>
    %1 = arith.truncf %0 : vector<16x6xf32> to vector<16x6xbf16>
    %c0_1 = arith.constant 0 : index
    %c0_2 = arith.constant 0 : index
    %2 = vector.load %arg2[%c0_1, %c0_2] : memref<6x32xbf16, #tpu.memory_space<vmem>>, vector<6x32xbf16>
    %cst = arith.constant dense<0.000000e+00> : vector<16x32xf32>
    %3 = tpu.matmul %1, %2, %cst {dimension_numbers = #tpu.dot_dimension_numbers<[1], [0], [0], [1], [0, 0, 1, 1], [], []>} : vector<16x6xbf16>, vector<6x32xbf16>, vector<16x32xf32> -> vector<16x32xf32>
    %c0_3 = arith.constant 0 : index
    %c0_4 = arith.constant 0 : index
    %4 = vector.load %arg3[%c0_3, %c0_4] : memref<1x32xf32, #tpu.memory_space<vmem>>, vector<1x32xf32>
    %5 = vector.broadcast %4 : vector<1x32xf32> to vector<16x32xf32>
    %6 = arith.addf %3, %5 : vector<16x32xf32>
    %c0_5 = arith.constant 0 : index
    %c0_6 = arith.constant 0 : index
    %7 = vector.load %arg4[%c0_5, %c0_6] : memref<16x32xf32, #tpu.memory_space<vmem>>, vector<16x32xf32>
    tpu.vector_store %arg4[%c0_5, %c0_6], %6 {strides = array<i32>} : memref<16x32xf32, #tpu.memory_space<vmem>>, vector<16x32xf32>,
    return
  }
  func.func @transform_0(%arg0: i32) -> (i32, i32) {
    %c0_i32 = arith.constant 0 : i32
    %c0_i32_0 = arith.constant 0 : i32
    return %arg0, %c0_i32 : i32, i32
  }
  func.func @transform_1(%arg0: i32) -> (i32, i32) {
    %c0_i32 = arith.constant 0 : i32
    %c0_i32_0 = arith.constant 0 : i32
    %c0_i32_1 = arith.constant 0 : i32
    return %c0_i32, %c0_i32_0 : i32, i32
  }
  func.func @transform_2(%arg0: i32) -> (i32, i32) {
    %c0_i32 = arith.constant 0 : i32
    %c0_i32_0 = arith.constant 0 : i32
    %c0_i32_1 = arith.constant 0 : i32
    return %c0_i32, %c0_i32_0 : i32, i32
  }
  func.func @transform_3(%arg0: i32) -> (i32, i32) {
    %c0_i32 = arith.constant 0 : i32
    %c0_i32_0 = arith.constant 0 : i32
    return %arg0, %c0_i32 : i32, i32
  }
}

module attributes {stable_mosaic.version = 11 : i64} {
  func.func @_peg_kernel(%arg0: i32, %arg1: memref<1x8x32xf32, #tpu.memory_space<vmem>>, %arg2: memref<3x32xf32, #tpu.memory_space<vmem>>, %arg3: memref<1x32xf32, #tpu.memory_space<vmem>>, %arg4: memref<1x8x32xf32, #tpu.memory_space<vmem>>) attributes {dimension_semantics = [#tpu.dimension_semantics<parallel>], iteration_bounds = array<i64: 2>, scalar_prefetch = 0 : i64, scratch_operands = 0 : i64, tpu.core_type = #tpu.core_type<tc>, window_params = [{transform_indices = @transform_0, window_bounds = array<i64: 1, 8, 32>}, {pipeline_mode = #tpu.pipeline_mode<synchronous>, transform_indices = @transform_1, window_bounds = array<i64: 3, 32>}, {pipeline_mode = #tpu.pipeline_mode<synchronous>, transform_indices = @transform_2, window_bounds = array<i64: 1, 32>}, {transform_indices = @transform_3, window_bounds = array<i64: 1, 8, 32>}]} {
    %c0 = arith.constant 0 : index
    %c0_0 = arith.constant 0 : index
    %c0_1 = arith.constant 0 : index
    %0 = vector.load %arg1[%c0, %c0_0, %c0_1] : memref<1x8x32xf32, #tpu.memory_space<vmem>>, vector<1x8x32xf32>
    %1 = vector.shape_cast %0 : vector<1x8x32xf32> to vector<8x32xf32>
    %cst = arith.constant 0.000000e+00 : f32
    %2 = vector.broadcast %cst : f32 to vector<1x32xf32>
    %3 = vector.extract_strided_slice %1 {offsets = [0, 0], sizes = [7, 32], strides = [1, 1]} : vector<8x32xf32> to vector<7x32xf32>
    %4 = tpu.concatenate %2, %3 in 0 : vector<1x32xf32>, vector<7x32xf32> -> vector<8x32xf32>
    %5 = vector.extract_strided_slice %1 {offsets = [1, 0], sizes = [7, 32], strides = [1, 1]} : vector<8x32xf32> to vector<7x32xf32>
    %6 = tpu.concatenate %5, %2 in 0 : vector<7x32xf32>, vector<1x32xf32> -> vector<8x32xf32>
    %c0_2 = arith.constant 0 : index
    %c0_3 = arith.constant 0 : index
    %7 = vector.load %arg2[%c0_2, %c0_3] : memref<3x32xf32, #tpu.memory_space<vmem>>, vector<3x32xf32>
    %8 = vector.extract_strided_slice %7 {offsets = [0, 0], sizes = [1, 32], strides = [1, 1]} : vector<3x32xf32> to vector<1x32xf32>
    %9 = vector.broadcast %8 : vector<1x32xf32> to vector<8x32xf32>
    %10 = arith.mulf %4, %9 : vector<8x32xf32>
    %11 = vector.extract_strided_slice %7 {offsets = [1, 0], sizes = [1, 32], strides = [1, 1]} : vector<3x32xf32> to vector<1x32xf32>
    %12 = vector.broadcast %11 : vector<1x32xf32> to vector<8x32xf32>
    %13 = arith.mulf %1, %12 : vector<8x32xf32>
    %14 = arith.addf %10, %13 : vector<8x32xf32>
    %15 = vector.extract_strided_slice %7 {offsets = [2, 0], sizes = [1, 32], strides = [1, 1]} : vector<3x32xf32> to vector<1x32xf32>
    %16 = vector.broadcast %15 : vector<1x32xf32> to vector<8x32xf32>
    %17 = arith.mulf %6, %16 : vector<8x32xf32>
    %18 = arith.addf %14, %17 : vector<8x32xf32>
    %c0_4 = arith.constant 0 : index
    %c0_5 = arith.constant 0 : index
    %19 = vector.load %arg3[%c0_4, %c0_5] : memref<1x32xf32, #tpu.memory_space<vmem>>, vector<1x32xf32>
    %20 = vector.broadcast %19 : vector<1x32xf32> to vector<8x32xf32>
    %21 = arith.addf %18, %20 : vector<8x32xf32>
    %22 = arith.addf %21, %1 : vector<8x32xf32>
    %c0_6 = arith.constant 0 : index
    %c0_7 = arith.constant 0 : index
    %c0_8 = arith.constant 0 : index
    %23 = vector.load %arg4[%c0_6, %c0_7, %c0_8] : memref<1x8x32xf32, #tpu.memory_space<vmem>>, vector<1x8x32xf32>
    %24 = vector.shape_cast %23 : vector<1x8x32xf32> to vector<8x32xf32>
    %25 = vector.shape_cast %22 : vector<8x32xf32> to vector<1x8x32xf32>
    tpu.vector_store %arg4[%c0_6, %c0_7, %c0_8], %25 {strides = array<i32>} : memref<1x8x32xf32, #tpu.memory_space<vmem>>, vector<1x8x32xf32>,
    return
  }
  func.func @transform_0(%arg0: i32) -> (i32, i32, i32) {
    %c0_i32 = arith.constant 0 : i32
    %c0_i32_0 = arith.constant 0 : i32
    %c0_i32_1 = arith.constant 0 : i32
    return %arg0, %c0_i32, %c0_i32_0 : i32, i32, i32
  }
  func.func @transform_1(%arg0: i32) -> (i32, i32) {
    %c0_i32 = arith.constant 0 : i32
    %c0_i32_0 = arith.constant 0 : i32
    %c0_i32_1 = arith.constant 0 : i32
    return %c0_i32, %c0_i32_0 : i32, i32
  }
  func.func @transform_2(%arg0: i32) -> (i32, i32) {
    %c0_i32 = arith.constant 0 : i32
    %c0_i32_0 = arith.constant 0 : i32
    %c0_i32_1 = arith.constant 0 : i32
    return %c0_i32, %c0_i32_0 : i32, i32
  }
  func.func @transform_3(%arg0: i32) -> (i32, i32, i32) {
    %c0_i32 = arith.constant 0 : i32
    %c0_i32_0 = arith.constant 0 : i32
    %c0_i32_1 = arith.constant 0 : i32
    return %arg0, %c0_i32, %c0_i32_0 : i32, i32, i32
  }
}

module attributes {stable_mosaic.version = 11 : i64} {
  func.func @_attn_block_kernel(%arg0: i32, %arg1: memref<1x8x96xf32, #tpu.memory_space<vmem>>, %arg2: memref<1x8x32xf32, #tpu.memory_space<vmem>>, %arg3: memref<32x32xbf16, #tpu.memory_space<vmem>>, %arg4: memref<1x32xf32, #tpu.memory_space<vmem>>, %arg5: memref<1x32xf32, #tpu.memory_space<vmem>>, %arg6: memref<1x32xf32, #tpu.memory_space<vmem>>, %arg7: memref<1x8x32xf32, #tpu.memory_space<vmem>>) attributes {dimension_semantics = [#tpu.dimension_semantics<parallel>], iteration_bounds = array<i64: 2>, scalar_prefetch = 0 : i64, scratch_operands = 0 : i64, tpu.core_type = #tpu.core_type<tc>, window_params = [{transform_indices = @transform_0, window_bounds = array<i64: 1, 8, 96>}, {transform_indices = @transform_1, window_bounds = array<i64: 1, 8, 32>}, {pipeline_mode = #tpu.pipeline_mode<synchronous>, transform_indices = @transform_2, window_bounds = array<i64: 32, 32>}, {pipeline_mode = #tpu.pipeline_mode<synchronous>, transform_indices = @transform_3, window_bounds = array<i64: 1, 32>}, {pipeline_mode = #tpu.pipeline_mode<synchronous>, transform_indices = @transform_4, window_bounds = array<i64: 1, 32>}, {pipeline_mode = #tpu.pipeline_mode<synchronous>, transform_indices = @transform_5, window_bounds = array<i64: 1, 32>}, {transform_indices = @transform_6, window_bounds = array<i64: 1, 8, 32>}]} {
    %c0 = arith.constant 0 : index
    %c0_0 = arith.constant 0 : index
    %c0_1 = arith.constant 0 : index
    %0 = vector.load %arg1[%c0, %c0_0, %c0_1] : memref<1x8x96xf32, #tpu.memory_space<vmem>>, vector<1x8x96xf32>
    %1 = vector.shape_cast %0 : vector<1x8x96xf32> to vector<8x96xf32>
    %c0_2 = arith.constant 0 : index
    %c0_3 = arith.constant 0 : index
    %c0_4 = arith.constant 0 : index
    %2 = vector.load %arg2[%c0_2, %c0_3, %c0_4] : memref<1x8x32xf32, #tpu.memory_space<vmem>>, vector<1x8x32xf32>
    %3 = vector.shape_cast %2 : vector<1x8x32xf32> to vector<8x32xf32>
    %4 = vector.extract_strided_slice %1 {offsets = [0, 0], sizes = [8, 8], strides = [1, 1]} : vector<8x96xf32> to vector<8x8xf32>
    %5 = arith.truncf %4 : vector<8x8xf32> to vector<8x8xbf16>
    %6 = vector.extract_strided_slice %1 {offsets = [0, 32], sizes = [8, 8], strides = [1, 1]} : vector<8x96xf32> to vector<8x8xf32>
    %7 = arith.truncf %6 : vector<8x8xf32> to vector<8x8xbf16>
    %8 = vector.extract_strided_slice %1 {offsets = [0, 64], sizes = [8, 8], strides = [1, 1]} : vector<8x96xf32> to vector<8x8xf32>
    %9 = arith.truncf %8 : vector<8x8xf32> to vector<8x8xbf16>
    %10 = tpu.transpose %7, [1, 0] : vector<8x8xbf16> -> vector<8x8xbf16>
    %cst = arith.constant dense<0.000000e+00> : vector<8x8xf32>
    %11 = tpu.matmul %5, %10, %cst {dimension_numbers = #tpu.dot_dimension_numbers<[1], [0], [0], [1], [0, 0, 1, 1], [], []>} : vector<8x8xbf16>, vector<8x8xbf16>, vector<8x8xf32> -> vector<8x8xf32>
    %cst_5 = arith.constant 0.353553385 : f32
    %12 = vector.broadcast %cst_5 : f32 to vector<8x8xf32>
    %13 = arith.mulf %11, %12 : vector<8x8xf32>
    %cst_6 = arith.constant dense<0xFF800000> : vector<8xf32>
    %14 = vector.multi_reduction <maximumf>, %13, %cst_6 [1] : vector<8x8xf32> to vector<8xf32>
    %15 = vector.shape_cast %14 : vector<8xf32> to vector<8x1xf32>
    %16 = vector.broadcast %15 : vector<8x1xf32> to vector<8x8xf32>
    %17 = arith.subf %13, %16 : vector<8x8xf32>
    %18 = math.exp %17 : vector<8x8xf32>
    %cst_7 = arith.constant dense<0.000000e+00> : vector<8xf32>
    %19 = vector.multi_reduction <add>, %18, %cst_7 [1] : vector<8x8xf32> to vector<8xf32>
    %20 = vector.shape_cast %19 : vector<8xf32> to vector<8x1xf32>
    %21 = vector.broadcast %20 : vector<8x1xf32> to vector<8x8xf32>
    %22 = arith.divf %18, %21 : vector<8x8xf32>
    %23 = arith.truncf %22 : vector<8x8xf32> to vector<8x8xbf16>
    %cst_8 = arith.constant dense<0.000000e+00> : vector<8x8xf32>
    %24 = tpu.matmul %23, %9, %cst_8 {dimension_numbers = #tpu.dot_dimension_numbers<[1], [0], [0], [1], [0, 0, 1, 1], [], []>} : vector<8x8xbf16>, vector<8x8xbf16>, vector<8x8xf32> -> vector<8x8xf32>
    %25 = vector.extract_strided_slice %1 {offsets = [0, 8], sizes = [8, 8], strides = [1, 1]} : vector<8x96xf32> to vector<8x8xf32>
    %26 = arith.truncf %25 : vector<8x8xf32> to vector<8x8xbf16>
    %27 = vector.extract_strided_slice %1 {offsets = [0, 40], sizes = [8, 8], strides = [1, 1]} : vector<8x96xf32> to vector<8x8xf32>
    %28 = arith.truncf %27 : vector<8x8xf32> to vector<8x8xbf16>
    %29 = vector.extract_strided_slice %1 {offsets = [0, 72], sizes = [8, 8], strides = [1, 1]} : vector<8x96xf32> to vector<8x8xf32>
    %30 = arith.truncf %29 : vector<8x8xf32> to vector<8x8xbf16>
    %31 = tpu.transpose %28, [1, 0] : vector<8x8xbf16> -> vector<8x8xbf16>
    %cst_9 = arith.constant dense<0.000000e+00> : vector<8x8xf32>
    %32 = tpu.matmul %26, %31, %cst_9 {dimension_numbers = #tpu.dot_dimension_numbers<[1], [0], [0], [1], [0, 0, 1, 1], [], []>} : vector<8x8xbf16>, vector<8x8xbf16>, vector<8x8xf32> -> vector<8x8xf32>
    %cst_10 = arith.constant 0.353553385 : f32
    %33 = vector.broadcast %cst_10 : f32 to vector<8x8xf32>
    %34 = arith.mulf %32, %33 : vector<8x8xf32>
    %cst_11 = arith.constant dense<0xFF800000> : vector<8xf32>
    %35 = vector.multi_reduction <maximumf>, %34, %cst_11 [1] : vector<8x8xf32> to vector<8xf32>
    %36 = vector.shape_cast %35 : vector<8xf32> to vector<8x1xf32>
    %37 = vector.broadcast %36 : vector<8x1xf32> to vector<8x8xf32>
    %38 = arith.subf %34, %37 : vector<8x8xf32>
    %39 = math.exp %38 : vector<8x8xf32>
    %cst_12 = arith.constant dense<0.000000e+00> : vector<8xf32>
    %40 = vector.multi_reduction <add>, %39, %cst_12 [1] : vector<8x8xf32> to vector<8xf32>
    %41 = vector.shape_cast %40 : vector<8xf32> to vector<8x1xf32>
    %42 = vector.broadcast %41 : vector<8x1xf32> to vector<8x8xf32>
    %43 = arith.divf %39, %42 : vector<8x8xf32>
    %44 = arith.truncf %43 : vector<8x8xf32> to vector<8x8xbf16>
    %cst_13 = arith.constant dense<0.000000e+00> : vector<8x8xf32>
    %45 = tpu.matmul %44, %30, %cst_13 {dimension_numbers = #tpu.dot_dimension_numbers<[1], [0], [0], [1], [0, 0, 1, 1], [], []>} : vector<8x8xbf16>, vector<8x8xbf16>, vector<8x8xf32> -> vector<8x8xf32>
    %46 = vector.extract_strided_slice %1 {offsets = [0, 16], sizes = [8, 8], strides = [1, 1]} : vector<8x96xf32> to vector<8x8xf32>
    %47 = arith.truncf %46 : vector<8x8xf32> to vector<8x8xbf16>
    %48 = vector.extract_strided_slice %1 {offsets = [0, 48], sizes = [8, 8], strides = [1, 1]} : vector<8x96xf32> to vector<8x8xf32>
    %49 = arith.truncf %48 : vector<8x8xf32> to vector<8x8xbf16>
    %50 = vector.extract_strided_slice %1 {offsets = [0, 80], sizes = [8, 8], strides = [1, 1]} : vector<8x96xf32> to vector<8x8xf32>
    %51 = arith.truncf %50 : vector<8x8xf32> to vector<8x8xbf16>
    %52 = tpu.transpose %49, [1, 0] : vector<8x8xbf16> -> vector<8x8xbf16>
    %cst_14 = arith.constant dense<0.000000e+00> : vector<8x8xf32>
    %53 = tpu.matmul %47, %52, %cst_14 {dimension_numbers = #tpu.dot_dimension_numbers<[1], [0], [0], [1], [0, 0, 1, 1], [], []>} : vector<8x8xbf16>, vector<8x8xbf16>, vector<8x8xf32> -> vector<8x8xf32>
    %cst_15 = arith.constant 0.353553385 : f32
    %54 = vector.broadcast %cst_15 : f32 to vector<8x8xf32>
    %55 = arith.mulf %53, %54 : vector<8x8xf32>
    %cst_16 = arith.constant dense<0xFF800000> : vector<8xf32>
    %56 = vector.multi_reduction <maximumf>, %55, %cst_16 [1] : vector<8x8xf32> to vector<8xf32>
    %57 = vector.shape_cast %56 : vector<8xf32> to vector<8x1xf32>
    %58 = vector.broadcast %57 : vector<8x1xf32> to vector<8x8xf32>
    %59 = arith.subf %55, %58 : vector<8x8xf32>
    %60 = math.exp %59 : vector<8x8xf32>
    %cst_17 = arith.constant dense<0.000000e+00> : vector<8xf32>
    %61 = vector.multi_reduction <add>, %60, %cst_17 [1] : vector<8x8xf32> to vector<8xf32>
    %62 = vector.shape_cast %61 : vector<8xf32> to vector<8x1xf32>
    %63 = vector.broadcast %62 : vector<8x1xf32> to vector<8x8xf32>
    %64 = arith.divf %60, %63 : vector<8x8xf32>
    %65 = arith.truncf %64 : vector<8x8xf32> to vector<8x8xbf16>
    %cst_18 = arith.constant dense<0.000000e+00> : vector<8x8xf32>
    %66 = tpu.matmul %65, %51, %cst_18 {dimension_numbers = #tpu.dot_dimension_numbers<[1], [0], [0], [1], [0, 0, 1, 1], [], []>} : vector<8x8xbf16>, vector<8x8xbf16>, vector<8x8xf32> -> vector<8x8xf32>
    %67 = vector.extract_strided_slice %1 {offsets = [0, 24], sizes = [8, 8], strides = [1, 1]} : vector<8x96xf32> to vector<8x8xf32>
    %68 = arith.truncf %67 : vector<8x8xf32> to vector<8x8xbf16>
    %69 = vector.extract_strided_slice %1 {offsets = [0, 56], sizes = [8, 8], strides = [1, 1]} : vector<8x96xf32> to vector<8x8xf32>
    %70 = arith.truncf %69 : vector<8x8xf32> to vector<8x8xbf16>
    %71 = vector.extract_strided_slice %1 {offsets = [0, 88], sizes = [8, 8], strides = [1, 1]} : vector<8x96xf32> to vector<8x8xf32>
    %72 = arith.truncf %71 : vector<8x8xf32> to vector<8x8xbf16>
    %73 = tpu.transpose %70, [1, 0] : vector<8x8xbf16> -> vector<8x8xbf16>
    %cst_19 = arith.constant dense<0.000000e+00> : vector<8x8xf32>
    %74 = tpu.matmul %68, %73, %cst_19 {dimension_numbers = #tpu.dot_dimension_numbers<[1], [0], [0], [1], [0, 0, 1, 1], [], []>} : vector<8x8xbf16>, vector<8x8xbf16>, vector<8x8xf32> -> vector<8x8xf32>
    %cst_20 = arith.constant 0.353553385 : f32
    %75 = vector.broadcast %cst_20 : f32 to vector<8x8xf32>
    %76 = arith.mulf %74, %75 : vector<8x8xf32>
    %cst_21 = arith.constant dense<0xFF800000> : vector<8xf32>
    %77 = vector.multi_reduction <maximumf>, %76, %cst_21 [1] : vector<8x8xf32> to vector<8xf32>
    %78 = vector.shape_cast %77 : vector<8xf32> to vector<8x1xf32>
    %79 = vector.broadcast %78 : vector<8x1xf32> to vector<8x8xf32>
    %80 = arith.subf %76, %79 : vector<8x8xf32>
    %81 = math.exp %80 : vector<8x8xf32>
    %cst_22 = arith.constant dense<0.000000e+00> : vector<8xf32>
    %82 = vector.multi_reduction <add>, %81, %cst_22 [1] : vector<8x8xf32> to vector<8xf32>
    %83 = vector.shape_cast %82 : vector<8xf32> to vector<8x1xf32>
    %84 = vector.broadcast %83 : vector<8x1xf32> to vector<8x8xf32>
    %85 = arith.divf %81, %84 : vector<8x8xf32>
    %86 = arith.truncf %85 : vector<8x8xf32> to vector<8x8xbf16>
    %cst_23 = arith.constant dense<0.000000e+00> : vector<8x8xf32>
    %87 = tpu.matmul %86, %72, %cst_23 {dimension_numbers = #tpu.dot_dimension_numbers<[1], [0], [0], [1], [0, 0, 1, 1], [], []>} : vector<8x8xbf16>, vector<8x8xbf16>, vector<8x8xf32> -> vector<8x8xf32>
    %88 = tpu.concatenate %24, %45, %66, %87 in 1 : vector<8x8xf32>, vector<8x8xf32>, vector<8x8xf32>, vector<8x8xf32> -> vector<8x32xf32>
    %89 = arith.truncf %88 : vector<8x32xf32> to vector<8x32xbf16>
    %c0_24 = arith.constant 0 : index
    %c0_25 = arith.constant 0 : index
    %90 = vector.load %arg3[%c0_24, %c0_25] : memref<32x32xbf16, #tpu.memory_space<vmem>>, vector<32x32xbf16>
    %cst_26 = arith.constant dense<0.000000e+00> : vector<8x32xf32>
    %91 = tpu.matmul %89, %90, %cst_26 {dimension_numbers = #tpu.dot_dimension_numbers<[1], [0], [0], [1], [0, 0, 1, 1], [], []>} : vector<8x32xbf16>, vector<32x32xbf16>, vector<8x32xf32> -> vector<8x32xf32>
    %c0_27 = arith.constant 0 : index
    %c0_28 = arith.constant 0 : index
    %92 = vector.load %arg4[%c0_27, %c0_28] : memref<1x32xf32, #tpu.memory_space<vmem>>, vector<1x32xf32>
    %93 = vector.broadcast %92 : vector<1x32xf32> to vector<8x32xf32>
    %94 = arith.addf %91, %93 : vector<8x32xf32>
    %95 = arith.addf %3, %94 : vector<8x32xf32>
    %cst_29 = arith.constant dense<0.000000e+00> : vector<8xf32>
    %96 = vector.multi_reduction <add>, %95, %cst_29 [1] : vector<8x32xf32> to vector<8xf32>
    %97 = vector.shape_cast %96 : vector<8xf32> to vector<8x1xf32>
    %cst_30 = arith.constant 3.200000e+01 : f32
    %98 = vector.broadcast %cst_30 : f32 to vector<8x1xf32>
    %99 = arith.divf %97, %98 : vector<8x1xf32>
    %100 = vector.broadcast %99 : vector<8x1xf32> to vector<8x32xf32>
    %101 = arith.subf %95, %100 : vector<8x32xf32>
    %102 = arith.mulf %101, %101 : vector<8x32xf32>
    %cst_31 = arith.constant dense<0.000000e+00> : vector<8xf32>
    %103 = vector.multi_reduction <add>, %102, %cst_31 [1] : vector<8x32xf32> to vector<8xf32>
    %104 = vector.shape_cast %103 : vector<8xf32> to vector<8x1xf32>
    %cst_32 = arith.constant 3.200000e+01 : f32
    %105 = vector.broadcast %cst_32 : f32 to vector<8x1xf32>
    %106 = arith.divf %104, %105 : vector<8x1xf32>
    %107 = vector.broadcast %99 : vector<8x1xf32> to vector<8x32xf32>
    %108 = arith.subf %95, %107 : vector<8x32xf32>
    %cst_33 = arith.constant 9.99999974E-6 : f32
    %109 = vector.broadcast %cst_33 : f32 to vector<8x1xf32>
    %110 = arith.addf %106, %109 : vector<8x1xf32>
    %111 = math.rsqrt %110 : vector<8x1xf32>
    %112 = vector.broadcast %111 : vector<8x1xf32> to vector<8x32xf32>
    %113 = arith.mulf %108, %112 : vector<8x32xf32>
    %c0_34 = arith.constant 0 : index
    %c0_35 = arith.constant 0 : index
    %114 = vector.load %arg5[%c0_34, %c0_35] : memref<1x32xf32, #tpu.memory_space<vmem>>, vector<1x32xf32>
    %115 = vector.broadcast %114 : vector<1x32xf32> to vector<8x32xf32>
    %116 = arith.mulf %113, %115 : vector<8x32xf32>
    %c0_36 = arith.constant 0 : index
    %c0_37 = arith.constant 0 : index
    %117 = vector.load %arg6[%c0_36, %c0_37] : memref<1x32xf32, #tpu.memory_space<vmem>>, vector<1x32xf32>
    %118 = vector.broadcast %117 : vector<1x32xf32> to vector<8x32xf32>
    %119 = arith.addf %116, %118 : vector<8x32xf32>
    %c0_38 = arith.constant 0 : index
    %c0_39 = arith.constant 0 : index
    %c0_40 = arith.constant 0 : index
    %120 = vector.load %arg7[%c0_38, %c0_39, %c0_40] : memref<1x8x32xf32, #tpu.memory_space<vmem>>, vector<1x8x32xf32>
    %121 = vector.shape_cast %120 : vector<1x8x32xf32> to vector<8x32xf32>
    %122 = vector.shape_cast %119 : vector<8x32xf32> to vector<1x8x32xf32>
    tpu.vector_store %arg7[%c0_38, %c0_39, %c0_40], %122 {strides = array<i32>} : memref<1x8x32xf32, #tpu.memory_space<vmem>>, vector<1x8x32xf32>,
    return
  }
  func.func @transform_0(%arg0: i32) -> (i32, i32, i32) {
    %c0_i32 = arith.constant 0 : i32
    %c0_i32_0 = arith.constant 0 : i32
    %c0_i32_1 = arith.constant 0 : i32
    return %arg0, %c0_i32, %c0_i32_0 : i32, i32, i32
  }
  func.func @transform_1(%arg0: i32) -> (i32, i32, i32) {
    %c0_i32 = arith.constant 0 : i32
    %c0_i32_0 = arith.constant 0 : i32
    %c0_i32_1 = arith.constant 0 : i32
    return %arg0, %c0_i32, %c0_i32_0 : i32, i32, i32
  }
  func.func @transform_2(%arg0: i32) -> (i32, i32) {
    %c0_i32 = arith.constant 0 : i32
    %c0_i32_0 = arith.constant 0 : i32
    %c0_i32_1 = arith.constant 0 : i32
    return %c0_i32, %c0_i32_0 : i32, i32
  }
  func.func @transform_3(%arg0: i32) -> (i32, i32) {
    %c0_i32 = arith.constant 0 : i32
    %c0_i32_0 = arith.constant 0 : i32
    %c0_i32_1 = arith.constant 0 : i32
    return %c0_i32, %c0_i32_0 : i32, i32
  }
  func.func @transform_4(%arg0: i32) -> (i32, i32) {
    %c0_i32 = arith.constant 0 : i32
    %c0_i32_0 = arith.constant 0 : i32
    %c0_i32_1 = arith.constant 0 : i32
    return %c0_i32, %c0_i32_0 : i32, i32
  }
  func.func @transform_5(%arg0: i32) -> (i32, i32) {
    %c0_i32 = arith.constant 0 : i32
    %c0_i32_0 = arith.constant 0 : i32
    %c0_i32_1 = arith.constant 0 : i32
    return %c0_i32, %c0_i32_0 : i32, i32
  }
  func.func @transform_6(%arg0: i32) -> (i32, i32, i32) {
    %c0_i32 = arith.constant 0 : i32
    %c0_i32_0 = arith.constant 0 : i32
    %c0_i32_1 = arith.constant 0 : i32
    return %arg0, %c0_i32, %c0_i32_0 : i32, i32, i32
  }
}

module attributes {stable_mosaic.version = 11 : i64} {
  func.func @_leff_kernel(%arg0: i32, %arg1: memref<1x8x32xf32, #tpu.memory_space<vmem>>, %arg2: memref<32x32xbf16, #tpu.memory_space<vmem>>, %arg3: memref<1x32xf32, #tpu.memory_space<vmem>>, %arg4: memref<3x32x32xbf16, #tpu.memory_space<vmem>>, %arg5: memref<1x32xf32, #tpu.memory_space<vmem>>, %arg6: memref<32x32xbf16, #tpu.memory_space<vmem>>, %arg7: memref<1x32xf32, #tpu.memory_space<vmem>>, %arg8: memref<1x32xf32, #tpu.memory_space<vmem>>, %arg9: memref<1x32xf32, #tpu.memory_space<vmem>>, %arg10: memref<1x8x32xf32, #tpu.memory_space<vmem>>) attributes {dimension_semantics = [#tpu.dimension_semantics<parallel>], iteration_bounds = array<i64: 2>, scalar_prefetch = 0 : i64, scratch_operands = 0 : i64, tpu.core_type = #tpu.core_type<tc>, window_params = [{transform_indices = @transform_0, window_bounds = array<i64: 1, 8, 32>}, {pipeline_mode = #tpu.pipeline_mode<synchronous>, transform_indices = @transform_1, window_bounds = array<i64: 32, 32>}, {pipeline_mode = #tpu.pipeline_mode<synchronous>, transform_indices = @transform_2, window_bounds = array<i64: 1, 32>}, {pipeline_mode = #tpu.pipeline_mode<synchronous>, transform_indices = @transform_3, window_bounds = array<i64: 3, 32, 32>}, {pipeline_mode = #tpu.pipeline_mode<synchronous>, transform_indices = @transform_4, window_bounds = array<i64: 1, 32>}, {pipeline_mode = #tpu.pipeline_mode<synchronous>, transform_indices = @transform_5, window_bounds = array<i64: 32, 32>}, {pipeline_mode = #tpu.pipeline_mode<synchronous>, transform_indices = @transform_6, window_bounds = array<i64: 1, 32>}, {pipeline_mode = #tpu.pipeline_mode<synchronous>, transform_indices = @transform_7, window_bounds = array<i64: 1, 32>}, {pipeline_mode = #tpu.pipeline_mode<synchronous>, transform_indices = @transform_8, window_bounds = array<i64: 1, 32>}, {transform_indices = @transform_9, window_bounds = array<i64: 1, 8, 32>}]} {
    %c0 = arith.constant 0 : index
    %c0_0 = arith.constant 0 : index
    %c0_1 = arith.constant 0 : index
    %0 = vector.load %arg1[%c0, %c0_0, %c0_1] : memref<1x8x32xf32, #tpu.memory_space<vmem>>, vector<1x8x32xf32>
    %1 = vector.shape_cast %0 : vector<1x8x32xf32> to vector<8x32xf32>
    %2 = arith.truncf %1 : vector<8x32xf32> to vector<8x32xbf16>
    %c0_2 = arith.constant 0 : index
    %c0_3 = arith.constant 0 : index
    %3 = vector.load %arg2[%c0_2, %c0_3] : memref<32x32xbf16, #tpu.memory_space<vmem>>, vector<32x32xbf16>
    %cst = arith.constant dense<0.000000e+00> : vector<8x32xf32>
    %4 = tpu.matmul %2, %3, %cst {dimension_numbers = #tpu.dot_dimension_numbers<[1], [0], [0], [1], [0, 0, 1, 1], [], []>} : vector<8x32xbf16>, vector<32x32xbf16>, vector<8x32xf32> -> vector<8x32xf32>
    %c0_4 = arith.constant 0 : index
    %c0_5 = arith.constant 0 : index
    %5 = vector.load %arg3[%c0_4, %c0_5] : memref<1x32xf32, #tpu.memory_space<vmem>>, vector<1x32xf32>
    %6 = vector.broadcast %5 : vector<1x32xf32> to vector<8x32xf32>
    %7 = arith.addf %4, %6 : vector<8x32xf32>
    %cst_6 = arith.constant 0.000000e+00 : f32
    %8 = vector.broadcast %cst_6 : f32 to vector<8x32xf32>
    %9 = arith.maximumf %7, %8 : vector<8x32xf32>
    %cst_7 = arith.constant 0.000000e+00 : f32
    %10 = vector.broadcast %cst_7 : f32 to vector<1x32xf32>
    %11 = vector.extract_strided_slice %9 {offsets = [0, 0], sizes = [7, 32], strides = [1, 1]} : vector<8x32xf32> to vector<7x32xf32>
    %12 = tpu.concatenate %10, %11 in 0 : vector<1x32xf32>, vector<7x32xf32> -> vector<8x32xf32>
    %13 = vector.extract_strided_slice %9 {offsets = [1, 0], sizes = [7, 32], strides = [1, 1]} : vector<8x32xf32> to vector<7x32xf32>
    %14 = tpu.concatenate %13, %10 in 0 : vector<7x32xf32>, vector<1x32xf32> -> vector<8x32xf32>
    %c0_8 = arith.constant 0 : index
    %c0_9 = arith.constant 0 : index
    %c0_10 = arith.constant 0 : index
    %15 = vector.load %arg4[%c0_8, %c0_9, %c0_10] : memref<3x32x32xbf16, #tpu.memory_space<vmem>>, vector<3x32x32xbf16>
    %16 = arith.truncf %12 : vector<8x32xf32> to vector<8x32xbf16>
    %17 = vector.extract_strided_slice %15 {offsets = [0, 0, 0], sizes = [1, 32, 32], strides = [1, 1, 1]} : vector<3x32x32xbf16> to vector<1x32x32xbf16>
    %18 = vector.shape_cast %17 : vector<1x32x32xbf16> to vector<32x32xbf16>
    %cst_11 = arith.constant dense<0.000000e+00> : vector<8x32xf32>
    %19 = tpu.matmul %16, %18, %cst_11 {dimension_numbers = #tpu.dot_dimension_numbers<[1], [0], [0], [1], [0, 0, 1, 1], [], []>} : vector<8x32xbf16>, vector<32x32xbf16>, vector<8x32xf32> -> vector<8x32xf32>
    %20 = arith.truncf %9 : vector<8x32xf32> to vector<8x32xbf16>
    %21 = vector.extract_strided_slice %15 {offsets = [1, 0, 0], sizes = [1, 32, 32], strides = [1, 1, 1]} : vector<3x32x32xbf16> to vector<1x32x32xbf16>
    %22 = vector.shape_cast %21 : vector<1x32x32xbf16> to vector<32x32xbf16>
    %cst_12 = arith.constant dense<0.000000e+00> : vector<8x32xf32>
    %23 = tpu.matmul %20, %22, %cst_12 {dimension_numbers = #tpu.dot_dimension_numbers<[1], [0], [0], [1], [0, 0, 1, 1], [], []>} : vector<8x32xbf16>, vector<32x32xbf16>, vector<8x32xf32> -> vector<8x32xf32>
    %24 = arith.addf %19, %23 : vector<8x32xf32>
    %25 = arith.truncf %14 : vector<8x32xf32> to vector<8x32xbf16>
    %26 = vector.extract_strided_slice %15 {offsets = [2, 0, 0], sizes = [1, 32, 32], strides = [1, 1, 1]} : vector<3x32x32xbf16> to vector<1x32x32xbf16>
    %27 = vector.shape_cast %26 : vector<1x32x32xbf16> to vector<32x32xbf16>
    %cst_13 = arith.constant dense<0.000000e+00> : vector<8x32xf32>
    %28 = tpu.matmul %25, %27, %cst_13 {dimension_numbers = #tpu.dot_dimension_numbers<[1], [0], [0], [1], [0, 0, 1, 1], [], []>} : vector<8x32xbf16>, vector<32x32xbf16>, vector<8x32xf32> -> vector<8x32xf32>
    %29 = arith.addf %24, %28 : vector<8x32xf32>
    %c0_14 = arith.constant 0 : index
    %c0_15 = arith.constant 0 : index
    %30 = vector.load %arg5[%c0_14, %c0_15] : memref<1x32xf32, #tpu.memory_space<vmem>>, vector<1x32xf32>
    %31 = vector.broadcast %30 : vector<1x32xf32> to vector<8x32xf32>
    %32 = arith.addf %29, %31 : vector<8x32xf32>
    %cst_16 = arith.constant 0.000000e+00 : f32
    %33 = vector.broadcast %cst_16 : f32 to vector<8x32xf32>
    %34 = arith.maximumf %32, %33 : vector<8x32xf32>
    %35 = arith.truncf %34 : vector<8x32xf32> to vector<8x32xbf16>
    %c0_17 = arith.constant 0 : index
    %c0_18 = arith.constant 0 : index
    %36 = vector.load %arg6[%c0_17, %c0_18] : memref<32x32xbf16, #tpu.memory_space<vmem>>, vector<32x32xbf16>
    %cst_19 = arith.constant dense<0.000000e+00> : vector<8x32xf32>
    %37 = tpu.matmul %35, %36, %cst_19 {dimension_numbers = #tpu.dot_dimension_numbers<[1], [0], [0], [1], [0, 0, 1, 1], [], []>} : vector<8x32xbf16>, vector<32x32xbf16>, vector<8x32xf32> -> vector<8x32xf32>
    %c0_20 = arith.constant 0 : index
    %c0_21 = arith.constant 0 : index
    %38 = vector.load %arg7[%c0_20, %c0_21] : memref<1x32xf32, #tpu.memory_space<vmem>>, vector<1x32xf32>
    %39 = vector.broadcast %38 : vector<1x32xf32> to vector<8x32xf32>
    %40 = arith.addf %37, %39 : vector<8x32xf32>
    %41 = arith.addf %1, %40 : vector<8x32xf32>
    %cst_22 = arith.constant dense<0.000000e+00> : vector<8xf32>
    %42 = vector.multi_reduction <add>, %41, %cst_22 [1] : vector<8x32xf32> to vector<8xf32>
    %43 = vector.shape_cast %42 : vector<8xf32> to vector<8x1xf32>
    %cst_23 = arith.constant 3.200000e+01 : f32
    %44 = vector.broadcast %cst_23 : f32 to vector<8x1xf32>
    %45 = arith.divf %43, %44 : vector<8x1xf32>
    %46 = vector.broadcast %45 : vector<8x1xf32> to vector<8x32xf32>
    %47 = arith.subf %41, %46 : vector<8x32xf32>
    %48 = arith.mulf %47, %47 : vector<8x32xf32>
    %cst_24 = arith.constant dense<0.000000e+00> : vector<8xf32>
    %49 = vector.multi_reduction <add>, %48, %cst_24 [1] : vector<8x32xf32> to vector<8xf32>
    %50 = vector.shape_cast %49 : vector<8xf32> to vector<8x1xf32>
    %cst_25 = arith.constant 3.200000e+01 : f32
    %51 = vector.broadcast %cst_25 : f32 to vector<8x1xf32>
    %52 = arith.divf %50, %51 : vector<8x1xf32>
    %53 = vector.broadcast %45 : vector<8x1xf32> to vector<8x32xf32>
    %54 = arith.subf %41, %53 : vector<8x32xf32>
    %cst_26 = arith.constant 9.99999974E-6 : f32
    %55 = vector.broadcast %cst_26 : f32 to vector<8x1xf32>
    %56 = arith.addf %52, %55 : vector<8x1xf32>
    %57 = math.rsqrt %56 : vector<8x1xf32>
    %58 = vector.broadcast %57 : vector<8x1xf32> to vector<8x32xf32>
    %59 = arith.mulf %54, %58 : vector<8x32xf32>
    %c0_27 = arith.constant 0 : index
    %c0_28 = arith.constant 0 : index
    %60 = vector.load %arg8[%c0_27, %c0_28] : memref<1x32xf32, #tpu.memory_space<vmem>>, vector<1x32xf32>
    %61 = vector.broadcast %60 : vector<1x32xf32> to vector<8x32xf32>
    %62 = arith.mulf %59, %61 : vector<8x32xf32>
    %c0_29 = arith.constant 0 : index
    %c0_30 = arith.constant 0 : index
    %63 = vector.load %arg9[%c0_29, %c0_30] : memref<1x32xf32, #tpu.memory_space<vmem>>, vector<1x32xf32>
    %64 = vector.broadcast %63 : vector<1x32xf32> to vector<8x32xf32>
    %65 = arith.addf %62, %64 : vector<8x32xf32>
    %c0_31 = arith.constant 0 : index
    %c0_32 = arith.constant 0 : index
    %c0_33 = arith.constant 0 : index
    %66 = vector.load %arg10[%c0_31, %c0_32, %c0_33] : memref<1x8x32xf32, #tpu.memory_space<vmem>>, vector<1x8x32xf32>
    %67 = vector.shape_cast %66 : vector<1x8x32xf32> to vector<8x32xf32>
    %68 = vector.shape_cast %65 : vector<8x32xf32> to vector<1x8x32xf32>
    tpu.vector_store %arg10[%c0_31, %c0_32, %c0_33], %68 {strides = array<i32>} : memref<1x8x32xf32, #tpu.memory_space<vmem>>, vector<1x8x32xf32>,
    return
  }
  func.func @transform_0(%arg0: i32) -> (i32, i32, i32) {
    %c0_i32 = arith.constant 0 : i32
    %c0_i32_0 = arith.constant 0 : i32
    %c0_i32_1 = arith.constant 0 : i32
    return %arg0, %c0_i32, %c0_i32_0 : i32, i32, i32
  }
  func.func @transform_1(%arg0: i32) -> (i32, i32) {
    %c0_i32 = arith.constant 0 : i32
    %c0_i32_0 = arith.constant 0 : i32
    %c0_i32_1 = arith.constant 0 : i32
    return %c0_i32, %c0_i32_0 : i32, i32
  }
  func.func @transform_2(%arg0: i32) -> (i32, i32) {
    %c0_i32 = arith.constant 0 : i32
    %c0_i32_0 = arith.constant 0 : i32
    %c0_i32_1 = arith.constant 0 : i32
    return %c0_i32, %c0_i32_0 : i32, i32
  }
  func.func @transform_3(%arg0: i32) -> (i32, i32, i32) {
    %c0_i32 = arith.constant 0 : i32
    %c0_i32_0 = arith.constant 0 : i32
    %c0_i32_1 = arith.constant 0 : i32
    %c0_i32_2 = arith.constant 0 : i32
    return %c0_i32, %c0_i32_0, %c0_i32_1 : i32, i32, i32
  }
  func.func @transform_4(%arg0: i32) -> (i32, i32) {
    %c0_i32 = arith.constant 0 : i32
    %c0_i32_0 = arith.constant 0 : i32
    %c0_i32_1 = arith.constant 0 : i32
    return %c0_i32, %c0_i32_0 : i32, i32
  }
  func.func @transform_5(%arg0: i32) -> (i32, i32) {
    %c0_i32 = arith.constant 0 : i32
    %c0_i32_0 = arith.constant 0 : i32
    %c0_i32_1 = arith.constant 0 : i32
    return %c0_i32, %c0_i32_0 : i32, i32
  }
  func.func @transform_6(%arg0: i32) -> (i32, i32) {
    %c0_i32 = arith.constant 0 : i32
    %c0_i32_0 = arith.constant 0 : i32
    %c0_i32_1 = arith.constant 0 : i32
    return %c0_i32, %c0_i32_0 : i32, i32
  }
  func.func @transform_7(%arg0: i32) -> (i32, i32) {
    %c0_i32 = arith.constant 0 : i32
    %c0_i32_0 = arith.constant 0 : i32
    %c0_i32_1 = arith.constant 0 : i32
    return %c0_i32, %c0_i32_0 : i32, i32
  }
  func.func @transform_8(%arg0: i32) -> (i32, i32) {
    %c0_i32 = arith.constant 0 : i32
    %c0_i32_0 = arith.constant 0 : i32
    %c0_i32_1 = arith.constant 0 : i32
    return %c0_i32, %c0_i32_0 : i32, i32
  }
  func.func @transform_9(%arg0: i32) -> (i32, i32, i32) {
    %c0_i32 = arith.constant 0 : i32
    %c0_i32_0 = arith.constant 0 : i32
    %c0_i32_1 = arith.constant 0 : i32
    return %arg0, %c0_i32, %c0_i32_0 : i32, i32, i32
  }
}

module attributes {stable_mosaic.version = 11 : i64} {
  func.func @_mlp_head_kernel(%arg0: i32, %arg1: memref<16x32xf32, #tpu.memory_space<vmem>>, %arg2: memref<32x32xbf16, #tpu.memory_space<vmem>>, %arg3: memref<1x32xf32, #tpu.memory_space<vmem>>, %arg4: memref<32x256xbf16, #tpu.memory_space<vmem>>, %arg5: memref<1x256xf32, #tpu.memory_space<vmem>>, %arg6: memref<16x256xf32, #tpu.memory_space<vmem>>) attributes {dimension_semantics = [#tpu.dimension_semantics<parallel>], iteration_bounds = array<i64: 1>, scalar_prefetch = 0 : i64, scratch_operands = 0 : i64, tpu.core_type = #tpu.core_type<tc>, window_params = [{transform_indices = @transform_0, window_bounds = array<i64: 16, 32>}, {pipeline_mode = #tpu.pipeline_mode<synchronous>, transform_indices = @transform_1, window_bounds = array<i64: 32, 32>}, {pipeline_mode = #tpu.pipeline_mode<synchronous>, transform_indices = @transform_2, window_bounds = array<i64: 1, 32>}, {pipeline_mode = #tpu.pipeline_mode<synchronous>, transform_indices = @transform_3, window_bounds = array<i64: 32, 256>}, {pipeline_mode = #tpu.pipeline_mode<synchronous>, transform_indices = @transform_4, window_bounds = array<i64: 1, 256>}, {transform_indices = @transform_5, window_bounds = array<i64: 16, 256>}]} {
    %c0 = arith.constant 0 : index
    %c0_0 = arith.constant 0 : index
    %0 = vector.load %arg1[%c0, %c0_0] : memref<16x32xf32, #tpu.memory_space<vmem>>, vector<16x32xf32>
    %1 = arith.truncf %0 : vector<16x32xf32> to vector<16x32xbf16>
    %c0_1 = arith.constant 0 : index
    %c0_2 = arith.constant 0 : index
    %2 = vector.load %arg2[%c0_1, %c0_2] : memref<32x32xbf16, #tpu.memory_space<vmem>>, vector<32x32xbf16>
    %cst = arith.constant dense<0.000000e+00> : vector<16x32xf32>
    %3 = tpu.matmul %1, %2, %cst {dimension_numbers = #tpu.dot_dimension_numbers<[1], [0], [0], [1], [0, 0, 1, 1], [], []>} : vector<16x32xbf16>, vector<32x32xbf16>, vector<16x32xf32> -> vector<16x32xf32>
    %c0_3 = arith.constant 0 : index
    %c0_4 = arith.constant 0 : index
    %4 = vector.load %arg3[%c0_3, %c0_4] : memref<1x32xf32, #tpu.memory_space<vmem>>, vector<1x32xf32>
    %5 = vector.broadcast %4 : vector<1x32xf32> to vector<16x32xf32>
    %6 = arith.addf %3, %5 : vector<16x32xf32>
    %7 = arith.truncf %6 : vector<16x32xf32> to vector<16x32xbf16>
    %c0_5 = arith.constant 0 : index
    %c0_6 = arith.constant 0 : index
    %8 = vector.load %arg4[%c0_5, %c0_6] : memref<32x256xbf16, #tpu.memory_space<vmem>>, vector<32x256xbf16>
    %cst_7 = arith.constant dense<0.000000e+00> : vector<16x256xf32>
    %9 = tpu.matmul %7, %8, %cst_7 {dimension_numbers = #tpu.dot_dimension_numbers<[1], [0], [0], [1], [0, 0, 1, 1], [], []>} : vector<16x32xbf16>, vector<32x256xbf16>, vector<16x256xf32> -> vector<16x256xf32>
    %c0_8 = arith.constant 0 : index
    %c0_9 = arith.constant 0 : index
    %10 = vector.load %arg5[%c0_8, %c0_9] : memref<1x256xf32, #tpu.memory_space<vmem>>, vector<1x256xf32>
    %11 = vector.broadcast %10 : vector<1x256xf32> to vector<16x256xf32>
    %12 = arith.addf %9, %11 : vector<16x256xf32>
    %c0_10 = arith.constant 0 : index
    %c0_11 = arith.constant 0 : index
    %13 = vector.load %arg6[%c0_10, %c0_11] : memref<16x256xf32, #tpu.memory_space<vmem>>, vector<16x256xf32>
    tpu.vector_store %arg6[%c0_10, %c0_11], %12 {strides = array<i32>} : memref<16x256xf32, #tpu.memory_space<vmem>>, vector<16x256xf32>,
    return
  }
  func.func @transform_0(%arg0: i32) -> (i32, i32) {
    %c0_i32 = arith.constant 0 : i32
    %c0_i32_0 = arith.constant 0 : i32
    return %arg0, %c0_i32 : i32, i32
  }
  func.func @transform_1(%arg0: i32) -> (i32, i32) {
    %c0_i32 = arith.constant 0 : i32
    %c0_i32_0 = arith.constant 0 : i32
    %c0_i32_1 = arith.constant 0 : i32
    return %c0_i32, %c0_i32_0 : i32, i32
  }
  func.func @transform_2(%arg0: i32) -> (i32, i32) {
    %c0_i32 = arith.constant 0 : i32
    %c0_i32_0 = arith.constant 0 : i32
    %c0_i32_1 = arith.constant 0 : i32
    return %c0_i32, %c0_i32_0 : i32, i32
  }
  func.func @transform_3(%arg0: i32) -> (i32, i32) {
    %c0_i32 = arith.constant 0 : i32
    %c0_i32_0 = arith.constant 0 : i32
    %c0_i32_1 = arith.constant 0 : i32
    return %c0_i32, %c0_i32_0 : i32, i32
  }
  func.func @transform_4(%arg0: i32) -> (i32, i32) {
    %c0_i32 = arith.constant 0 : i32
    %c0_i32_0 = arith.constant 0 : i32
    %c0_i32_1 = arith.constant 0 : i32
    return %c0_i32, %c0_i32_0 : i32, i32
  }
  func.func @transform_5(%arg0: i32) -> (i32, i32) {
    %c0_i32 = arith.constant 0 : i32
    %c0_i32_0 = arith.constant 0 : i32
    return %arg0, %c0_i32 : i32, i32
  }
}

</mosaic_0001>

<bundles_post_ra>
// kernel: octformer_fwd.9
= control target key start
LH: loop header
LB: loop body
LE: loop exit
PB: predicated region body
PF: predicated region fallthrough
CT: control target
= control target key end

     0   :  { %vm30_vm0 = vcmask 1042432   ;;  %v94_v0 = vmov 0.0   ;;  %vm95_vm1 = vmmov 0   ;;  %vm26_vm2 = vcmask 48128   ;;  %s134_s1 = inlined_call_operand.vmem [shape: bf16[6,32], index: 1, kind: input, shape index: {}]   ;;  %s135_s0 = inlined_call_operand.vmem [shape: f32[16,6], index: 0, kind: input, shape index: {}]   ;;  %s136_s2 = inlined_call_operand.vmem [shape: f32[1,32], index: 2, kind: input, shape index: {}]   ;;  %s137_s3 = inlined_call_operand.vmem [shape: f32[16,32], index: 3, kind: output, shape index: {}]  }
   0x1   :  { %86 = vmatprep.subr.bf16.mxu0 %v94_v0  ;;  %v18_v1 = vld [vmem:[%s134_s1] sm:$0x7]  ;;  %88 = vmatprep.mubr.msk.bf16.mxu0 %vm95_vm1, %v94_v0  ;;  %v16_v3 = vld [vmem:[%s135_s0 + $0x8] sm:$0xff]  ;;  %vm75_vm3 = vcmask 261120  }
   0x2   :  { %v15_v2 = vld [vmem:[%s135_s0] sm:$0xff]  ;;  %v32_v4 = vsel %vm30_vm0, %v18_v1, 0 }
   0x3   :  { %v17_v5 = vpack.c.bf16 %v16_v3, %v15_v2  ;;  %87 = vmatpush3.bf16.msra.mxu0 %v32_v4  ;;  %v82_v6 = vld [vmem:[%s136_s2] ss:$0 sm:$0xff] }
   0x6   :  { %89 = vmatmul.mubr.msk.bf16.vlgmr.msra.gmra.mxu0 %vm26_vm2, %v17_v5 }
  0xc6   :  { %v68_v7 = vpop.f32.mrf.mxu0 }
  0xc7   :  { %v69_v8 = vadd.f32 %v82_v6, %v68_v7 }
  0xc8   :  { %v90_v9 = vpop.f32.mrf.mxu0 }
  0xc9   :  { %76 = vst.msk [vmem:[%s137_s3] sm:$0xff] %vm75_vm3, %v69_v8 }
  0xca   :  { %v71_v10 = vpop.f32.mrf.mxu0 }
  0xcb   :  { %v72_v11 = vadd.f32 %v82_v6, %v71_v10 }
  0xcc   :  { %v91_v12 = vpop.f32.mrf.mxu0 }
  0xcd   :  { %77 = vst.msk [vmem:[%s137_s3 + $0x8] sm:$0xff] %vm75_vm3, %v72_v11 }

// kernel: octformer_fwd.10
= control target key start
LH: loop header
LB: loop body
LE: loop exit
PB: predicated region body
PF: predicated region fallthrough
CT: control target
= control target key end

     0   :  { %s304_s12 = smov 0   ;;  %s327_s0 = inlined_call_operand.vmem [shape: f32[2,8,32], index: 0, kind: input, shape index: {}]   ;;  %s328_s1 = inlined_call_operand.vmem [shape: f32[3,32], index: 1, kind: input, shape index: {}]   ;;  %s329_s2 = inlined_call_operand.vmem [shape: f32[1,32], index: 2, kind: input, shape index: {}]   ;;  %s330_s3 = inlined_call_operand.vmem [shape: f32[2,8,32], index: 3, kind: output, shape index: {}]  }
   0x1 LB: > { %s258_s13 = sadd.s32 4294967295, %s282_s12   ;;  %p262_p0 = scmp.ge.s32.totalorder %s282_s12, 1  ;;  %s282_s12 = sphi %s304_s12, %s13_s12  }
   0x2   : > { %p136_p1 = scmp.lt.s32.totalorder %s282_s12, 3 }
   0x4   : > { %p137_p2 = pnand %p262_p0, %p136_p1 }
   0x5   : > { %p158_p3 = scmp.lt.s32.totalorder (!%p137_p2), %s258_s13, 1 }
   0x6   : > { %140 = sbr.rel (%p137_p2) target bundleno = 30 (0x1e), region = 32 }
   0xb   : > { %v177_v0 = vlaneseq  ;;  %s332_s13 = smov (!%p158_p3, %s258_s13), 1  ;;  %v176_v2 = vld [vmem:[%s328_s1] sm:$0x7]  ;;  %vm170_vm0 = vcmask 1040384   ;;  %vm174_vm1 = vcmask 1046528   ;;  %vm203_vm2 = vcmask 261120  }
   0xc   : > { %s263_s16 = sshll.u32 %s332_s13, 3  ;;  %v265_v18 = vld [vmem:[%s329_s2] ss:$0 sm:$0xff] }
   0xd   : > { %v178_v1 = vshrl.u32 %v177_v0, 7  ;;  %s161_s19 = scalar_lea.vmem %s327_s0, %s263_s16  ;;  %s165_s24 = scalar_lea.vmem %s330_s3, %s263_s16 }
   0xe   : > { %v166_v6 = vld [vmem:[%s161_s19] sm:$0xff] }
   0xf   : > { %v179_v3 = vsub.s32 0, %v178_v1  ;;  %v184_v4 = vsub.s32 1, %v178_v1  ;;  %v190_v5 = vsub.s32 2, %v178_v1  ;;  %v168_v10 = vrot.slane %v166_v6, 7 }
  0x10   : > { %v172_v11 = vrot.slane %v166_v6, 1 }
  0x11   : > { %v180_v7 = vrot.slane %v176_v2, %v179_v3  ;;  %v185_v8 = vrot.slane %v176_v2, %v184_v4  ;;  %v191_v9 = vrot.slane %v176_v2, %v190_v5  ;;  %v171_v13 = vsel %vm170_vm0, 0.0, %v168_v10 }
  0x12   : > { %v175_v14 = vsel %vm174_vm1, %v172_v11, 0.0 }
  0x13   : > { %v186_v12 = vmul.f32 %v185_v8, %v166_v6  ;;  %v181_v15 = vmul.f32 %v180_v7, %v171_v13  ;;  %v192_v16 = vmul.f32 %v191_v9, %v175_v14 }
  0x15   : > { %v187_v17 = vadd.f32 %v186_v12, %v181_v15 }
  0x17   : > { %v193_v19 = vadd.f32 %v192_v16, %v187_v17 }
  0x19   : > { %v201_v20 = vadd.f32 %v265_v18, %v193_v19 }
  0x1b   : > { %v202_v21 = vadd.f32 %v201_v20, %v166_v6 }
  0x1d   : > { %204 = vst.msk [vmem:[%s165_s24] sm:$0xff] %vm203_vm2, %v202_v21 }
  0x1e PF: > { %s13_s12 = sadd.s32 1, %s282_s12  }
  0x1f   : > { %p10_p4 = scmp.ge.s32.totalorder %s13_s12, 4  }
  0x21   :  { %12 = sbr.rel (!%p10_p4) target bundleno = 1 (0x1), region = 62 }

// kernel: octformer_fwd.11
= control target key start
LH: loop header
LB: loop body
LE: loop exit
PB: predicated region body
PF: predicated region fallthrough
CT: control target
= control target key end

     0   :  { %v112_v0 = vmov 0.0   ;;  %vm113_vm0 = vmmov 0   ;;  %vm41_vm1 = vcmask 261120   ;;  %vm86_vm2 = vcmask 785408   ;;  %s155_s1 = inlined_call_operand.vmem [shape: bf16[32,96], index: 1, kind: input, shape index: {}]   ;;  %s156_s0 = inlined_call_operand.vmem [shape: f32[16,32], index: 0, kind: input, shape index: {}]   ;;  %s157_s2 = inlined_call_operand.vmem [shape: f32[1,96], index: 2, kind: input, shape index: {}]   ;;  %s158_s3 = inlined_call_operand.vmem [shape: f32[16,96], index: 3, kind: output, shape index: {}]  }
   0x1   :  { %100 = vmatprep.subr.bf16.mxu0 %v112_v0  ;;  %v110_v1 = vld [vmem:[%s155_s1 + $0x8] sm:$0xff]   ;;  %104 = vmatprep.mubr.msk.bf16.mxu0 %vm113_vm0, %v112_v0  ;;  %v111_v2 = vld [vmem:[%s155_s1] sm:$0xff]  }
   0x2   :  { %101 = vmatpush3.bf16.msra.mxu0 %v110_v1  ;;  %v15_v3 = vld [vmem:[%s156_s0] sm:$0xff]  ;;  %v16_v4 = vld [vmem:[%s156_s0 + $0x8] sm:$0xff] }
   0x3   :  { %102 = vmatprep.subr.bf16.mxu0 %v112_v0  ;;  %v17_v5 = vpack.c.bf16 %v16_v4, %v15_v3  ;;  %v93_v6 = vld [vmem:[%s157_s2] ss:$0 sm:$0xff] }
   0x6   :  { %103 = vmatpush3.bf16.msra.mxu0 %v111_v2 }
   0x9   :  { %105 = vmatmul.mubr.msk.bf16.vlgmr.msra.gmra.mxu0 %vm41_vm1, %v17_v5 }
  0xc9   :  { %v79_v7 = vpop.f32.mrf.mxu0 }
  0xca   :  { %v80_v8 = vadd.f32 %v93_v6, %v79_v7 }
  0xcb   :  { %v106_v9 = vpop.f32.mrf.mxu0 }
  0xcc   :  { %87 = vst.msk [vmem:[%s158_s3] sm:$0xff] %vm86_vm2, %v80_v8 }
  0xcd   :  { %v82_v10 = vpop.f32.mrf.mxu0 }
  0xce   :  { %v83_v11 = vadd.f32 %v93_v6, %v82_v10 }
  0xcf   :  { %v107_v12 = vpop.f32.mrf.mxu0 }
  0xd0   :  { %88 = vst.msk [vmem:[%s158_s3 + $0x8] sm:$0xff] %vm86_vm2, %v83_v11 }

// kernel: octformer_fwd.17
= control target key start
LH: loop header
LB: loop body
LE: loop exit
PB: predicated region body
PF: predicated region fallthrough
CT: control target
= control target key end

     0   :  { %v252_v1 = vmov 0.0   ;;  %vm253_vm0 = vmmov 0   ;;  %s323_s0 = inlined_call_operand.vmem [shape: f32[16,32], index: 0, kind: input, shape index: {}]   ;;  %s324_s1 = inlined_call_operand.vmem [shape: bf16[32,32], index: 1, kind: input, shape index: {}]   ;;  %s325_s2 = inlined_call_operand.vmem [shape: f32[1,32], index: 2, kind: input, shape index: {}]   ;;  %s326_s3 = inlined_call_operand.vmem [shape: bf16[32,256], index: 3, kind: input, shape index: {}]   ;;  %s327_s4 = inlined_call_operand.vmem [shape: f32[1,256], index: 4, kind: input, shape index: {}]   ;;  %s328_s5 = inlined_call_operand.hbm [shape: f32[16,256], index: 5, kind: output, shape index: {}]  }
   0x1   :  { %v222_v0 = vld [vmem:[%s324_s1 + $0x8] sm:$0xff]   ;;  %208 = vmatprep.subr.bf16.mxu0 %v252_v1  ;;  %v223_v2 = vld [vmem:[%s324_s1] sm:$0xff]   ;;  %212 = vmatprep.mubr.msk.bf16.mxu0 %vm253_vm0, %v252_v1 }
   0x2   :  { %209 = vmatpush3.bf16.msra.mxu0 %v222_v0  ;;  %v22_v3 = vld [vmem:[%s323_s0] sm:$0xff]  ;;  %v23_v4 = vld [vmem:[%s323_s0 + $0x8] sm:$0xff] }
   0x3   :  { %210 = vmatprep.subr.bf16.mxu0 %v252_v1 }
   0x4   :  { %10 = vsyncpa [#allocation3], 0  ;;  %v24_v5 = vpack.c.bf16 %v23_v4, %v22_v3  ;;  %vm48_vm1 = vcmask 261120   ;;  %v224_v6 = vld [vmem:[%s326_s3 + $0x14] ss:$8 sps:$4 sm:$0xff]   ;;  %v254_v10 = vmov 0   ;;  %v100_v19 = vlaneseq }
   0x5   :  { %v226_v7 = vld [vmem:[%s326_s3 + $0x10] ss:$8 sps:$4 sm:$0xff]   ;;  %145 = vmatprep.subr.bf16.mxu1 %v224_v6  ;;  %v227_v8 = vld [vmem:[%s326_s3 + $0x4] ss:$8 sps:$4 sm:$0xff]   ;;  %v229_v9 = vld [vmem:[%s326_s3] ss:$8 sps:$4 sm:$0xff]   ;;  %165 = vmatprep.mubr.bf16.mxu1 %v254_v10 }
   0x6   :  { %211 = vmatpush3.bf16.msra.mxu0 %v223_v2  ;;  %146 = vmatpush1.bf16.msra.mxu1 %v226_v7  ;;  %v196_v12 = vld [vmem:[%s325_s2] ss:$0 sm:$0xff]  ;;  %v101_v20 = vshrl.u32 %v100_v19, 7  ;;  %s255_s2 = smov [#allocation2]  }
   0x7   :  { %147 = vmatprep.subr.bf16.mxu1 %v227_v8  ;;  %v98_v22 = vld [vmem:[%s327_s4] sm:$0x3]  ;;  %s185_s10 = sshll.u32 %s255_s2, 4  ;;  %s186_s10 = int_to_ptr.vmem [resolvable:$true] %s185_s10 }
   0x8   :  { %v102_v21 = vsub.s32 0, %v101_v20  ;;  %v106_v23 = vsub.s32 1, %v101_v20  ;;  %s230_s11 = scalar_lea.vmem %s186_s10, 512  ;;  %p235_p1 = scmp.lt.s32.totalorder %s186_s10, %s186_s10 }
   0x9   :  { %213 = vmatmul.mubr.msk.bf16.vlgmr.msra.gmra.mxu0 %vm48_vm1, %v24_v5  ;;  %p231_p0 = scmp.ne.s32.totalorder %s186_s10, %s230_s11  ;;  %p236_p2 = scmp.lt.s32.totalorder %s230_s11, %s230_s11 }
   0xa   :  { %148 = vmatpush1.bf16.msra.mxu1 %v229_v9  ;;  %v103_v24 = vrot.slane %v98_v22, %v102_v21  ;;  %v107_v25 = vrot.slane %v98_v22, %v106_v23 }
   0xb   :  { %p237_p3 = por %p236_p2, %p235_p1 }
   0xd   :  { %p238_p4 = pnand %p237_p3, %p231_p0 }
  0xc9   :  { %v86_v11 = vpop.f32.mrf.mxu0 }
  0xca   :  { %v87_v15 = vadd.f32 %v196_v12, %v86_v11 }
  0xcb   :  { %v214_v13 = vpop.f32.mrf.mxu0 }
  0xcd   :  { %v89_v14 = vpop.f32.mrf.mxu0 }
  0xce   :  { %v90_v16 = vadd.f32 %v196_v12, %v89_v14 }
  0xcf   :  { %v215_v17 = vpop.f32.mrf.mxu0 }
  0xd0   :  { %v93_v18 = vpack.c.bf16 %v90_v16, %v87_v15 }
  0xd2   :  { %204 = vmatmul.mubr.msk.bf16.vlgmr.msra.gmra.mxu1 %vm48_vm1, %v93_v18 }
 0x192   :  { %v167_v26 = vpop.f32.mrf.mxu1 }
 0x193   :  { %v168_v27 = vadd.f32 %v167_v26, %v103_v24 }
 0x194   :  { %v169_v28 = vpop.f32.mrf.mxu1 }
 0x195   :  { %176 = vst [vmem:[#allocation2] sm:$0xff] %v168_v27  ;;  %v170_v29 = vadd.f32 %v169_v28, %v107_v25 }
 0x196   :  { %v171_v30 = vpop.f32.mrf.mxu1 }
 0x197   :  { %177 = vst [vmem:[#allocation2 + $0x8] sm:$0xff] %v170_v29  ;;  %v172_v31 = vadd.f32 %v171_v30, %v103_v24 }
 0x198   :  { %v173_v32 = vpop.f32.mrf.mxu1 }
 0x199   :  { %178 = vst [vmem:[#allocation2 + $0x10] sm:$0xff] %v172_v31  ;;  %v174_v33 = vadd.f32 %v173_v32, %v107_v25 }
 0x19b   :  { %179 = vst [vmem:[#allocation2 + $0x18] sm:$0xff] %v174_v33 }
 0x19c   :  { %241 = shalt.err (!%p238_p4)
}
 0x19d   :  { %s256_s4 = smov 256   ;;  %s257_s12 = smov 16  }
 0x19e   :  { %191 = dma.vmem_to_hbm [thread:$0]  %s186_s10, 512, %s328_s5, [#allocation3], %s256_s4, %s256_s4, %s257_s12  }
 0x19f   :  { %250 = dma.done.wait [#allocation3], 512  }
 0x1a0   :  { %251 = vsyncadd [#allocation3], 4294966784 }
 0x1a1   :  { %195 = vsyncpa [#allocation3], 1 }

// kernel: octformer_fwd.12
= control target key start
LH: loop header
LB: loop body
LE: loop exit
PB: predicated region body
PF: predicated region fallthrough
CT: control target
= control target key end

     0   :  { %s1097_s21 = smov 0   ;;  %s1211_s0 = inlined_call_operand.vmem [shape: f32[2,8,96], index: 0, kind: input, shape index: {}]   ;;  %s1212_s1 = inlined_call_operand.vmem [shape: f32[2,8,32], index: 1, kind: input, shape index: {}]   ;;  %s1213_s2 = inlined_call_operand.vmem [shape: bf16[32,32], index: 2, kind: input, shape index: {}]   ;;  %s1214_s3 = inlined_call_operand.vmem [shape: f32[1,32], index: 3, kind: input, shape index: {}]   ;;  %s1215_s4 = inlined_call_operand.vmem [shape: f32[1,32], index: 4, kind: input, shape index: {}]   ;;  %s1216_s5 = inlined_call_operand.vmem [shape: f32[1,32], index: 5, kind: input, shape index: {}]   ;;  %s1217_s6 = inlined_call_operand.vmem [shape: f32[2,8,32], index: 6, kind: output, shape index: {}]  }
   0x1 LB: > { %s895_s22 = sadd.s32 4294967295, %s1044_s21   ;;  %p899_p0 = scmp.ge.s32.totalorder %s1044_s21, 1  ;;  %s1044_s21 = sphi %s1097_s21, %s16_s21  }
   0x2   : > { %p220_p1 = scmp.lt.s32.totalorder %s1044_s21, 3 }
   0x4   : > { %p221_p2 = pnand %p899_p0, %p220_p1 }
   0x5   : > { %p252_p3 = scmp.lt.s32.totalorder (!%p221_p2), %s895_s22, 1  ;;  %s1048_s27 = smov (!%p221_p2), 96  }
   0x6   : > { %224 = sbr.rel (%p221_p2) target bundleno = 2044 (0x7fc), region = 44  ;;  %s1049_s28 = smov (!%p221_p2), 64  }
   0x7   : > { %s1050_s29 = smov (!%p221_p2), 88   ;;  %s1051_s30 = smov (!%p221_p2), 72  }
   0x8   : > { %s1052_s7 = smov (!%p221_p2), 120   ;;  %s1053_s8 = smov (!%p221_p2), 80  }
   0x9   : > { %s1054_s9 = smov (!%p221_p2), 112   ;;  %s1055_s10 = smov (!%p221_p2), 104  }
   0xa   : > { %s1056_s11 = smov (!%p221_p2), 56   ;;  %s1057_s12 = smov (!%p221_p2), 48  }
   0xb   : > { %v1046_v0 = vmov 0.0   ;;  %vm1047_vm0 = vmmov 0   ;;  %s1219_s22 = smov (!%p252_p3, %s895_s22), 1  ;;  %vm271_vm1 = vcmask 64512   ;;  %vm336_vm2 = vcmask 1043456   ;;  %s1058_s13 = smov 40  }
   0xc   : > { %938 = vmatprep.subr.bf16.mxu0 %v1046_v0  ;;  %940 = vmatprep.mubr.msk.bf16.mxu0 %vm1047_vm0, %v1046_v0  ;;  %s1111_s23 = sshll.u32 %s1219_s22, 3  ;;  %s1059_s14 = smov 8   ;;  %vm726_vm3 = vcmask 130048   ;;  %vm728_vm4 = vcmask 195584   ;;  %vm754_vm5 = vcmask 261120  }
   0xd   : > { %944 = vmatprep.subr.bf16.mxu1 %v1046_v0  ;;  %946 = vmatprep.mubr.msk.bf16.mxu1 %vm1047_vm0, %v1046_v0  ;;  %s255_s26 = scalar_lea.vmem %s1211_s0, %s1111_s23  ;;  %s1060_s19 = smov 16  }
   0xe   : > { %v265_v1 = vld [vmem:[%s255_s26] sm:$0xff]  ;;  %s1061_s20 = smov 24   ;;  %s259_s25 = scalar_lea.vmem %s1212_s1, %s1111_s23 }
   0xf   : > { %v1117_v2 = vpack.c.bf16 %v265_v1, %v265_v1 }
  0x11   : > { %269 = vrot.lane.b32.xlu0 %v1117_v2, %s1048_s27  ;;  %331 = vrot.lane.b32.xlu1 %v1117_v2, %s1049_s28 }
  0x15   : > { %382 = vrot.lane.b32.xlu1 %v1117_v2, %s1050_s29 }
  0x83   : > { %v270_v3 = vpop.permute.xlu0 %269  ;;  %v332_v11 = vpop.permute.xlu1 %331 }
  0x84   : > { %v276_v4 = vsel %vm271_vm1, %v270_v3, 0  ;;  %v338_v12 = vsel %vm336_vm2, %v332_v11, 0 }
  0x85   : > { %939 = vmatpush3.bf16.xpose.msra.mxu0 %v276_v4  ;;  %945 = vmatpush3.bf16.msra.mxu1 %v338_v12 }
  0x86   : > { %956 = vmatprep.subr.bf16.mxu0 %v1046_v0  ;;  %950 = vmatprep.subr.bf16.mxu1 %v1046_v0 }
  0x87   : > { %v383_v18 = vpop.permute.xlu1 %382 }
  0x88   : > { %v388_v24 = vsel %vm271_vm1, %v383_v18, 0 }
  0x8c   : > { %941 = vmatmul.mubr.msk.bf16.vlgmr.msra.gmra.mxu0 %vm271_vm1, %v1117_v2 }
  0x8d   : > { %958 = vmatprep.mubr.msk.bf16.mxu0 %vm1047_vm0, %v1046_v0 }
 0x14c   : > { %v312_v5 = vpop.f32.mrf.mxu0 }
 0x14d   : > { %v318_v6 = vmul.f32 0.35355338, %v312_v5 }
 0x14e   : > { %v942_v7 = vpop.f32.mrf.mxu0 }
 0x14f   : > { %v319_v8 = vsel %vm271_vm1, %v318_v6, -inf }
 0x150   : > { %320 = vmax.xlane.f32.xlu0 %v319_v8  ;;  %v315_v9 = vpop.f32.mrf.mxu0 }
 0x152   : > { %v943_v10 = vpop.f32.mrf.mxu0 }
 0x166   : > { %604 = vrot.lane.b32.xlu0 %v1117_v2, %s1051_s30 }
 0x1d9   : > { %v321_v13 = vpop.xlane.xlu0 %320 }
 0x1da   : > { %v322_v14 = vsub.f32 %v318_v6, %v321_v13 }
 0x1dc   : > { %v323_v15 = vmul.f32 1.442695, %v322_v14 }
 0x1dd   : > { %v605_v27 = vpop.permute.xlu0 %604 }
 0x1de   : > { %1020 = vpow2.f32 %v323_v15  ;;  %v610_v29 = vsel %vm271_vm1, %v605_v27, 0  ;;  %v1018_v27 = vld [vmem:[%s1213_s2 + $0x8] sm:$0xff]  }
 0x1eb   : > { %v1021_v16 = vpop.eup %1020 }
 0x1ec   : > { %v325_v17 = vsel %vm271_vm1, %v1021_v16, 0.0 }
 0x1ed   : > { %326 = vadd.xlane.f32.xlu1 %v325_v17 }
 0x1fe   : > { %380 = vrot.lane.b32.xlu1 %v1117_v2, %s1052_s7 }
 0x202   : > { %493 = vrot.lane.b32.xlu1 %v1117_v2, %s1053_s8 }
 0x206   : > { %491 = vrot.lane.b32.xlu1 %v1117_v2, %s1054_s9 }
 0x20a   : > { %602 = vrot.lane.b32.xlu1 %v1117_v2, %s1055_s10  ;;  %s263_s10 = scalar_lea.vmem %s1217_s6, %s1111_s23 }
 0x276   : > { %v327_v19 = vpop.xlane.xlu1 %326 }
 0x277   : > { %1022 = vrcp.f32 %v327_v19 }
 0x27a   : > { %v381_v22 = vpop.permute.xlu1 %380 }
 0x27e   : > { %v494_v25 = vpop.permute.xlu1 %493 }
 0x27f   : > { %v499_v26 = vsel %vm271_vm1, %v494_v25, 0 }
 0x282   : > { %v492_v28 = vpop.permute.xlu1 %491 }
 0x284   : > { %v1023_v20 = vpop.eup %1022 }
 0x285   : > { %v329_v21 = vmul.f32 %v1023_v20, %v1021_v16 }
 0x286   : > { %v603_v30 = vpop.permute.xlu1 %602 }
 0x287   : > { %v330_v23 = vpack.c.bf16 %v329_v21, %v329_v21 }
 0x289   : > { %947 = vmatmul.mubr.msk.bf16.vlgmr.msra.gmra.mxu1 %vm271_vm1, %v330_v23 }
 0x28a   : > { %951 = vmatpush3.bf16.xpose.msra.mxu1 %v388_v24  ;;  %952 = vmatprep.mubr.msk.bf16.mxu1 %vm1047_vm0, %v1046_v0 }
 0x28b   : > { %962 = vmatprep.subr.bf16.mxu1 %v1046_v0 }
 0x291   : > { %953 = vmatmul.mubr.msk.bf16.vlgmr.msra.gmra.mxu1 %vm271_vm1, %v381_v22 }
 0x292   : > { %963 = vmatpush3.bf16.xpose.msra.mxu1 %v499_v26  ;;  %964 = vmatprep.mubr.msk.bf16.mxu1 %vm1047_vm0, %v1046_v0 }
 0x293   : > { %974 = vmatprep.subr.bf16.mxu1 %v1046_v0 }
 0x299   : > { %965 = vmatmul.mubr.msk.bf16.vlgmr.msra.gmra.mxu1 %vm271_vm1, %v492_v28  ;;  %v1019_v28 = vld [vmem:[%s1213_s2] sm:$0xff]  }
 0x29a   : > { %975 = vmatpush3.bf16.xpose.msra.mxu1 %v610_v29  ;;  %976 = vmatprep.mubr.msk.bf16.mxu1 %vm1047_vm0, %v1046_v0 }
 0x29b   : > { %986 = vmatprep.subr.bf16.mxu1 %v1046_v0 }
 0x2a1   : > { %977 = vmatmul.mubr.msk.bf16.vlgmr.msra.gmra.mxu1 %vm271_vm1, %v603_v30 }
 0x2a2   : > { %990 = vmatprep.mubr.msk.bf16.mxu1 %vm1047_vm0, %v1046_v0  ;;  %987 = vmatpush3.bf16.msra.mxu1 %v1018_v27 }
 0x2a3   : > { %988 = vmatprep.subr.bf16.mxu1 %v1046_v0 }
 0x2a6   : > { %989 = vmatpush3.bf16.msra.mxu1 %v1019_v28 }
 0x349   : > { %v1155_v31 = vpop.f32.mrf.mxu1 }
 0x34b   : > { %v948_v32 = vpop.f32.mrf.mxu1 }
 0x34d   : > { %v377_v33 = vpop.f32.mrf.mxu1 }
 0x34f   : > { %v949_v34 = vpop.f32.mrf.mxu1 }
 0x351   : > { %v424_v35 = vpop.f32.mrf.mxu1 }
 0x352   : > { %v430_v36 = vmul.f32 0.35355338, %v424_v35 }
 0x353   : > { %v954_v37 = vpop.f32.mrf.mxu1 }
 0x354   : > { %v431_v38 = vsel %vm271_vm1, %v430_v36, -inf }
 0x355   : > { %432 = vmax.xlane.f32.xlu1 %v431_v38  ;;  %v427_v39 = vpop.f32.mrf.mxu1 }
 0x357   : > { %v955_v40 = vpop.f32.mrf.mxu1 }
 0x359   : > { %v535_v41 = vpop.f32.mrf.mxu1 }
 0x35a   : > { %v541_v42 = vmul.f32 0.35355338, %v535_v41 }
 0x35b   : > { %v966_v43 = vpop.f32.mrf.mxu1 }
 0x35c   : > { %v542_v44 = vsel %vm271_vm1, %v541_v42, -inf }
 0x35d   : > { %543 = vmax.xlane.f32.xlu0 %v542_v44  ;;  %v538_v45 = vpop.f32.mrf.mxu1  ;;  %v911_v44 = vld [vmem:[%s1214_s3] ss:$0 sm:$0xff] }
 0x35f   : > { %v967_v46 = vpop.f32.mrf.mxu1 }
 0x360   : > { %v266_v46 = vld [vmem:[%s259_s25] sm:$0xff] }
 0x361   : > { %v646_v47 = vpop.f32.mrf.mxu1 }
 0x362   : > { %v652_v48 = vmul.f32 0.35355338, %v646_v47 }
 0x363   : > { %v978_v49 = vpop.f32.mrf.mxu1 }
 0x364   : > { %v653_v50 = vsel %vm271_vm1, %v652_v48, -inf }
 0x365   : > { %654 = vmax.xlane.f32.xlu1 %v653_v50  ;;  %v649_v51 = vpop.f32.mrf.mxu1 }
 0x367   : > { %v979_v52 = vpop.f32.mrf.mxu1 }
 0x3de   : > { %v433_v53 = vpop.xlane.xlu1 %432 }
 0x3df   : > { %v434_v54 = vsub.f32 %v430_v36, %v433_v53 }
 0x3e1   : > { %v435_v55 = vmul.f32 1.442695, %v434_v54 }
 0x3e3   : > { %1024 = vpow2.f32 %v435_v55 }
 0x3e6   : > { %v544_v63 = vpop.xlane.xlu0 %543 }
 0x3e7   : > { %v545_v1 = vsub.f32 %v541_v42, %v544_v63  ;;  %v916_v63 = vld [vmem:[%s1216_s5] ss:$0 sm:$0xff] }
 0x3e9   : > { %v546_v3 = vmul.f32 1.442695, %v545_v1 }
 0x3ee   : > { %v655_v56 = vpop.xlane.xlu1 %654 }
 0x3ef   : > { %v656_v57 = vsub.f32 %v652_v48, %v655_v56 }
 0x3f0   : > { %v1025_v58 = vpop.eup %1024 }
 0x3f1   : > { %v657_v59 = vmul.f32 1.442695, %v656_v57  ;;  %v437_v60 = vsel %vm271_vm1, %v1025_v58, 0.0 }
 0x3f2   : > { %438 = vadd.xlane.f32.xlu1 %v437_v60 }
 0x3f3   : > { %1026 = vpow2.f32 %v657_v59 }
 0x3f4   : > { %1028 = vpow2.f32 %v546_v3 }
 0x400   : > { %v1027_v61 = vpop.eup %1026 }
 0x401   : > { %v659_v62 = vsel %vm271_vm1, %v1027_v61, 0.0  ;;  %v1029_v4 = vpop.eup %1028 }
 0x402   : > { %660 = vadd.xlane.f32.xlu0 %v659_v62  ;;  %v548_v5 = vsel %vm271_vm1, %v1029_v4, 0.0 }
 0x403   : > { %443 = vrot.lane.b32.xlu1 %v1117_v2, %s1056_s11 }
 0x418   : > { %554 = vrot.lane.b32.xlu0 %v1117_v2, %s1057_s12 }
 0x427   : > { %549 = vadd.xlane.f32.xlu1 %v548_v5 }
 0x438   : > { %665 = vrot.lane.b32.xlu1 %v1117_v2, %s1058_s13 }
 0x47b   : > { %v439_v6 = vpop.xlane.xlu1 %438 }
 0x47c   : > { %1030 = vrcp.f32 %v439_v6 }
 0x47f   : > { %v444_v7 = vpop.permute.xlu1 %443 }
 0x480   : > { %v449_v8 = vsel %vm336_vm2, %v444_v7, 0 }
 0x481   : > { %957 = vmatpush3.bf16.msra.mxu0 %v449_v8 }
 0x482   : > { %968 = vmatprep.subr.bf16.mxu0 %v1046_v0 }
 0x489   : > { %v1031_v9 = vpop.eup %1030 }
 0x48a   : > { %v441_v10 = vmul.f32 %v1031_v9, %v1025_v58 }
 0x48b   : > { %v661_v11 = vpop.xlane.xlu0 %660 }
 0x48c   : > { %v442_v12 = vpack.c.bf16 %v441_v10, %v441_v10 }
 0x48e   : > { %959 = vmatmul.mubr.msk.bf16.vlgmr.msra.gmra.mxu0 %vm271_vm1, %v442_v12 }
 0x48f   : > { %v555_v13 = vpop.permute.xlu0 %554  ;;  %970 = vmatprep.mubr.msk.bf16.mxu0 %vm1047_vm0, %v1046_v0 }
 0x490   : > { %v560_v2 = vsel %vm336_vm2, %v555_v13, 0 }
 0x491   : > { %969 = vmatpush3.bf16.msra.mxu0 %v560_v2 }
 0x492   : > { %980 = vmatprep.subr.bf16.mxu0 %v1046_v0 }
 0x4b0   : > { %v550_v14 = vpop.xlane.xlu1 %549 }
 0x4b1   : > { %1032 = vrcp.f32 %v550_v14 }
 0x4b2   : > { %1034 = vrcp.f32 %v661_v11 }
 0x4b4   : > { %v666_v16 = vpop.permute.xlu1 %665 }
 0x4b5   : > { %v671_v18 = vsel %vm336_vm2, %v666_v16, 0 }
 0x4be   : > { %v1033_v15 = vpop.eup %1032 }
 0x4bf   : > { %v552_v17 = vmul.f32 %v1033_v15, %v1029_v4  ;;  %v1035_v20 = vpop.eup %1034 }
 0x4c0   : > { %v663_v21 = vmul.f32 %v1035_v20, %v1027_v61  ;;  %v915_v61 = vld [vmem:[%s1215_s4] ss:$0 sm:$0xff] }
 0x4c1   : > { %v553_v19 = vpack.c.bf16 %v552_v17, %v552_v17 }
 0x4c2   : > { %v664_v22 = vpack.c.bf16 %v663_v21, %v663_v21 }
 0x4c3   : > { %971 = vmatmul.mubr.msk.bf16.vlgmr.msra.gmra.mxu0 %vm271_vm1, %v553_v19 }
 0x4c4   : > { %981 = vmatpush3.bf16.msra.mxu0 %v671_v18  ;;  %982 = vmatprep.mubr.msk.bf16.mxu0 %vm1047_vm0, %v1046_v0 }
 0x4cb   : > { %983 = vmatmul.mubr.msk.bf16.vlgmr.msra.gmra.mxu0 %vm271_vm1, %v664_v22 }
 0x54e   : > { %v485_v23 = vpop.f32.mrf.mxu0 }
 0x54f   : > { %714 = vrot.lane.b32.xlu1 %v485_v23, %s1059_s14 }
 0x550   : > { %v960_v24 = vpop.f32.mrf.mxu0 }
 0x552   : > { %v488_v25 = vpop.f32.mrf.mxu0 }
 0x554   : > { %v961_v26 = vpop.f32.mrf.mxu0 }
 0x583   : > { %v596_v29 = vpop.f32.mrf.mxu0 }
 0x584   : > { %718 = vrot.lane.b32.xlu0 %v596_v29, %s1060_s19 }
 0x585   : > { %v972_v30 = vpop.f32.mrf.mxu0 }
 0x587   : > { %v599_v32 = vpop.f32.mrf.mxu0 }
 0x589   : > { %v973_v33 = vpop.f32.mrf.mxu0 }
 0x58b   : > { %v707_v34 = vpop.f32.mrf.mxu0 }
 0x58c   : > { %722 = vrot.lane.b32.xlu1 %v707_v34, %s1061_s20 }
 0x58d   : > { %v984_v35 = vpop.f32.mrf.mxu0 }
 0x58f   : > { %v710_v36 = vpop.f32.mrf.mxu0 }
 0x591   : > { %v985_v37 = vpop.f32.mrf.mxu0 }
 0x5c1   : > { %v715_v38 = vpop.permute.xlu1 %714 }
 0x5c2   : > { %v725_v0 = vsel %vm271_vm1, %v1155_v31, %v715_v38 }
 0x5f6   : > { %v719_v39 = vpop.permute.xlu0 %718 }
 0x5f7   : > { %v727_v40 = vsel %vm726_vm3, %v725_v0, %v719_v39 }
 0x5fe   : > { %v723_v41 = vpop.permute.xlu1 %722 }
 0x5ff   : > { %v729_v42 = vsel %vm728_vm4, %v727_v40, %v723_v41 }
 0x600   : > { %v730_v43 = vpack.c.bf16 %v729_v42, %v729_v42 }
 0x602   : > { %991 = vmatmul.mubr.msk.bf16.vlgmr.msra.gmra.mxu1 %vm754_vm5, %v730_v43 }
 0x6c2   : > { %v792_v45 = vpop.f32.mrf.mxu1 }
 0x6c3   : > { %v793_v47 = vadd.f32 %v911_v44, %v792_v45 }
 0x6c4   : > { %v992_v48 = vpop.f32.mrf.mxu1 }
 0x6c5   : > { %v798_v31 = vadd.f32 %v793_v47, %v266_v46 }
 0x6c6   : > { %v795_v49 = vpop.f32.mrf.mxu1 }
 0x6c7   : > { %v799_v50 = vsel %vm754_vm5, %v798_v31, 0.0 }
 0x6c8   : > { %800 = vadd.xlane.f32.xlu0 %v799_v50  ;;  %v993_v51 = vpop.f32.mrf.mxu1 }
 0x751   : > { %v801_v52 = vpop.xlane.xlu0 %800 }
 0x752   : > { %v803_v53 = vmul.f32 0.03125, %v801_v52 }
 0x754   : > { %v804_v54 = vsub.f32 %v798_v31, %v803_v53 }
 0x756   : > { %v805_v55 = vmul.f32 %v804_v54, %v804_v54 }
 0x758   : > { %v806_v56 = vsel %vm754_vm5, %v805_v55, 0.0 }
 0x759   : > { %807 = vadd.xlane.f32.xlu1 %v806_v56 }
 0x7e2   : > { %v808_v57 = vpop.xlane.xlu1 %807 }
 0x7e3   : > { %v809_v58 = vmul.f32 0.03125, %v808_v57 }
 0x7e5   : > { %v810_v59 = vadd.f32 1e-05, %v809_v58 }
 0x7e7   : > { %1036 = vrsqrt.f32 %v810_v59 }
 0x7f4   : > { %v1037_v60 = vpop.eup %1036 }
 0x7f5   : > { %v812_v62 = vmul.f32 %v1037_v60, %v804_v54 }
 0x7f7   : > { %v820_v1 = vmul.f32 %v915_v61, %v812_v62 }
 0x7f9   : > { %v828_v3 = vadd.f32 %v916_v63, %v820_v1 }
 0x7fb   : > { %829 = vst.msk [vmem:[%s263_s10] sm:$0xff] %vm754_vm5, %v828_v3 }
 0x7fc PF: > { %s16_s21 = sadd.s32 1, %s1044_s21  }
 0x7fd   : > { %p13_p4 = scmp.ge.s32.totalorder %s16_s21, 4  }
 0x7ff   :  { %15 = sbr.rel (!%p13_p4) target bundleno = 1 (0x1), region = 77 }

// kernel: octformer_fwd.13
= control target key start
LH: loop header
LB: loop body
LE: loop exit
PB: predicated region body
PF: predicated region fallthrough
CT: control target
= control target key end

     0   :  { %s916_s30 = smov 0   ;;  %s1003_s0 = inlined_call_operand.vmem [shape: f32[2,8,32], index: 0, kind: input, shape index: {}]   ;;  %s1004_s1 = inlined_call_operand.vmem [shape: bf16[32,32], index: 1, kind: input, shape index: {}]   ;;  %s1005_s2 = inlined_call_operand.vmem [shape: f32[1,32], index: 2, kind: input, shape index: {}]   ;;  %s1006_s3 = inlined_call_operand.vmem [shape: bf16[3,32,32], index: 3, kind: input, shape index: {}]   ;;  %s1007_s4 = inlined_call_operand.vmem [shape: f32[1,32], index: 4, kind: input, shape index: {}]   ;;  %s1008_s5 = inlined_call_operand.vmem [shape: bf16[32,32], index: 5, kind: input, shape index: {}]   ;;  %s1009_s6 = inlined_call_operand.vmem [shape: f32[1,32], index: 6, kind: input, shape index: {}]   ;;  %s1010_s7 = inlined_call_operand.vmem [shape: f32[1,32], index: 7, kind: input, shape index: {}]   ;;  %s1011_s8 = inlined_call_operand.vmem [shape: f32[1,32], index: 8, kind: input, shape index: {}]   ;;  %s1012_s9 = inlined_call_operand.vmem [shape: f32[2,8,32], index: 9, kind: output, shape index: {}]  }
   0x1 LB: > { %s750_s10 = sadd.s32 4294967295, %s862_s30   ;;  %p754_p0 = scmp.ge.s32.totalorder %s862_s30, 1  ;;  %s862_s30 = sphi %s916_s30, %s19_s30  }
   0x2   : > { %p286_p1 = scmp.lt.s32.totalorder %s862_s30, 3 }
   0x4   : > { %p287_p2 = pnand %p754_p0, %p286_p1 }
   0x5   : > { %p320_p3 = scmp.lt.s32.totalorder (!%p287_p2), %s750_s10, 1 }
   0x6   : > { %290 = sbr.rel (%p287_p2) target bundleno = 934 (0x3a6), region = 56 }
   0xb   : > { %v844_v0 = vld [vmem:[%s1004_s1 + $0x8] sm:$0xff]   ;;  %v864_v1 = vmov 0.0   ;;  %v845_v2 = vld [vmem:[%s1004_s1] sm:$0xff]   ;;  %vm865_vm0 = vmmov 0   ;;  %v846_v3 = vld [vmem:[%s1006_s3 + $0x18] sm:$0xff]   ;;  %s1014_s10 = smov (!%p320_p3, %s750_s10), 1 }
   0xc   : > { %794 = vmatprep.subr.bf16.mxu0 %v864_v1  ;;  %802 = vmatprep.subr.bf16.mxu1 %v864_v1  ;;  %s755_s17 = sshll.u32 %s1014_s10, 3  ;;  %vm354_vm1 = vcmask 261120   ;;  %v848_v6 = vld [vmem:[%s1006_s3 + $0x8] sm:$0xff]   ;;  %v847_v7 = vld [vmem:[%s1006_s3 + $0x10] sm:$0xff]   ;;  %v849_v8 = vld [vmem:[%s1006_s3] sm:$0xff]   ;;  %vm402_vm2 = vcmask 1040384  }
   0xd   : > { %795 = vmatpush3.bf16.msra.mxu0 %v844_v0  ;;  %798 = vmatprep.mubr.msk.bf16.mxu0 %vm865_vm0, %v864_v1  ;;  %s323_s20 = scalar_lea.vmem %s1003_s0, %s755_s17  ;;  %v757_v9 = vld [vmem:[%s1005_s2] ss:$0 sm:$0xff]  ;;  %v850_v15 = vld [vmem:[%s1006_s3 + $0x28] sm:$0xff]   ;;  %vm406_vm3 = vcmask 1046528   ;;  %s327_s29 = scalar_lea.vmem %s1012_s9, %s755_s17 }
   0xe   : > { %796 = vmatprep.subr.bf16.mxu0 %v864_v1  ;;  %806 = vmatprep.mubr.msk.bf16.mxu1 %vm865_vm0, %v864_v1  ;;  %v943_v4 = vld [vmem:[%s323_s20] sm:$0xff]  ;;  %v852_v25 = vld [vmem:[%s1008_s5 + $0x8] sm:$0xff]  }
   0xf   : > { %803 = vmatpush3.bf16.msra.mxu1 %v846_v3  ;;  %v330_v5 = vpack.c.bf16 %v943_v4, %v943_v4  ;;  %v851_v22 = vld [vmem:[%s1006_s3 + $0x20] sm:$0xff]  }
  0x10   : > { %804 = vmatprep.subr.bf16.mxu1 %v864_v1  ;;  %v853_v26 = vld [vmem:[%s1008_s5] sm:$0xff]  }
  0x11   : > { %797 = vmatpush3.bf16.msra.mxu0 %v845_v2  ;;  %v770_v36 = vld [vmem:[%s1007_s4] ss:$0 sm:$0xff] }
  0x12   : > { %810 = vmatprep.subr.bf16.mxu0 %v864_v1  ;;  %v771_v45 = vld [vmem:[%s1009_s6] ss:$0 sm:$0xff] }
  0x13   : > { %805 = vmatpush3.bf16.msra.mxu1 %v847_v7  ;;  %v775_v62 = vld [vmem:[%s1010_s7] ss:$0 sm:$0xff] }
  0x14   : > { %799 = vmatmul.mubr.msk.bf16.vlgmr.msra.gmra.mxu0 %vm354_vm1, %v330_v5  ;;  %818 = vmatprep.subr.bf16.mxu1 %v864_v1  ;;  %v776_v0 = vld [vmem:[%s1011_s8] ss:$0 sm:$0xff] }
  0x15   : > { %814 = vmatprep.mubr.msk.bf16.mxu0 %vm865_vm0, %v864_v1  ;;  %811 = vmatpush3.bf16.msra.mxu0 %v848_v6 }
  0x16   : > { %812 = vmatprep.subr.bf16.mxu0 %v864_v1 }
  0x19   : > { %813 = vmatpush3.bf16.msra.mxu0 %v849_v8 }
  0x1a   : > { %826 = vmatprep.subr.bf16.mxu0 %v864_v1 }
  0xd4   : > { %v392_v10 = vpop.f32.mrf.mxu0 }
  0xd5   : > { %v393_v11 = vadd.f32 %v757_v9, %v392_v10 }
  0xd6   : > { %v800_v12 = vpop.f32.mrf.mxu0 }
  0xd7   : > { %v398_v13 = vmax.f32 %v393_v11, 0.0 }
  0xd8   : > { %v395_v14 = vpop.f32.mrf.mxu0 }
  0xd9   : > { %v400_v16 = vrot.slane %v398_v13, 7  ;;  %v421_v17 = vpack.c.bf16 %v398_v13, %v398_v13  ;;  %v404_v18 = vrot.slane %v398_v13, 1 }
  0xda   : > { %v801_v19 = vpop.f32.mrf.mxu0 }
  0xdb   : > { %v403_v20 = vsel %vm402_vm2, 0.0, %v400_v16  ;;  %807 = vmatmul.mubr.msk.bf16.vlgmr.msra.gmra.mxu1 %vm354_vm1, %v421_v17  ;;  %v407_v23 = vsel %vm406_vm3, %v404_v18, 0.0 }
  0xdc   : > { %v420_v21 = vpack.c.bf16 %v403_v20, %v403_v20  ;;  %819 = vmatpush3.bf16.msra.mxu1 %v850_v15  ;;  %822 = vmatprep.mubr.msk.bf16.mxu1 %vm865_vm0, %v864_v1  ;;  %v532_v24 = vpack.c.bf16 %v407_v23, %v407_v23 }
  0xdd   : > { %820 = vmatprep.subr.bf16.mxu1 %v864_v1 }
  0xde   : > { %815 = vmatmul.mubr.msk.bf16.vlgmr.msra.gmra.mxu0 %vm354_vm1, %v420_v21 }
  0xdf   : > { %830 = vmatprep.mubr.msk.bf16.mxu0 %vm865_vm0, %v864_v1  ;;  %827 = vmatpush3.bf16.msra.mxu0 %v852_v25 }
  0xe0   : > { %821 = vmatpush3.bf16.msra.mxu1 %v851_v22  ;;  %828 = vmatprep.subr.bf16.mxu0 %v864_v1 }
  0xe3   : > { %823 = vmatmul.mubr.msk.bf16.vlgmr.msra.gmra.mxu1 %vm354_vm1, %v532_v24  ;;  %829 = vmatpush3.bf16.msra.mxu0 %v853_v26 }
 0x19b   : > { %v471_v27 = vpop.f32.mrf.mxu1 }
 0x19d   : > { %v808_v28 = vpop.f32.mrf.mxu1 }
 0x19e   : > { %v526_v29 = vpop.f32.mrf.mxu0 }
 0x19f   : > { %v474_v30 = vpop.f32.mrf.mxu1  ;;  %v527_v33 = vadd.f32 %v526_v29, %v471_v27 }
 0x1a0   : > { %v816_v31 = vpop.f32.mrf.mxu0 }
 0x1a1   : > { %v809_v32 = vpop.f32.mrf.mxu1 }
 0x1a2   : > { %v529_v34 = vpop.f32.mrf.mxu0 }
 0x1a3   : > { %v582_v35 = vpop.f32.mrf.mxu1 }
 0x1a4   : > { %v588_v37 = vadd.f32 %v582_v35, %v527_v33  ;;  %v817_v38 = vpop.f32.mrf.mxu0 }
 0x1a5   : > { %v824_v39 = vpop.f32.mrf.mxu1 }
 0x1a6   : > { %v596_v40 = vadd.f32 %v770_v36, %v588_v37 }
 0x1a7   : > { %v585_v41 = vpop.f32.mrf.mxu1 }
 0x1a8   : > { %v597_v42 = vmax.f32 %v596_v40, 0.0 }
 0x1a9   : > { %v825_v43 = vpop.f32.mrf.mxu1 }
 0x1aa   : > { %v598_v44 = vpack.c.bf16 %v597_v42, %v597_v42 }
 0x1ac   : > { %831 = vmatmul.mubr.msk.bf16.vlgmr.msra.gmra.mxu0 %vm354_vm1, %v598_v44 }
 0x26c   : > { %v659_v46 = vpop.f32.mrf.mxu0 }
 0x26d   : > { %v660_v47 = vadd.f32 %v771_v45, %v659_v46 }
 0x26e   : > { %v832_v48 = vpop.f32.mrf.mxu0 }
 0x26f   : > { %v665_v49 = vadd.f32 %v660_v47, %v943_v4 }
 0x270   : > { %v662_v50 = vpop.f32.mrf.mxu0 }
 0x271   : > { %v666_v51 = vsel %vm354_vm1, %v665_v49, 0.0 }
 0x272   : > { %667 = vadd.xlane.f32.xlu0 %v666_v51  ;;  %v833_v52 = vpop.f32.mrf.mxu0 }
 0x2fb   : > { %v668_v53 = vpop.xlane.xlu0 %667 }
 0x2fc   : > { %v670_v54 = vmul.f32 0.03125, %v668_v53 }
 0x2fe   : > { %v671_v55 = vsub.f32 %v665_v49, %v670_v54 }
 0x300   : > { %v672_v56 = vmul.f32 %v671_v55, %v671_v55 }
 0x302   : > { %v673_v57 = vsel %vm354_vm1, %v672_v56, 0.0 }
 0x303   : > { %674 = vadd.xlane.f32.xlu0 %v673_v57 }
 0x38c   : > { %v675_v58 = vpop.xlane.xlu0 %674 }
 0x38d   : > { %v676_v59 = vmul.f32 0.03125, %v675_v58 }
 0x38f   : > { %v677_v60 = vadd.f32 1e-05, %v676_v59 }
 0x391   : > { %854 = vrsqrt.f32 %v677_v60 }
 0x39e   : > { %v855_v61 = vpop.eup %854 }
 0x39f   : > { %v679_v63 = vmul.f32 %v855_v61, %v671_v55 }
 0x3a1   : > { %v687_v1 = vmul.f32 %v775_v62, %v679_v63 }
 0x3a3   : > { %v695_v2 = vadd.f32 %v776_v0, %v687_v1 }
 0x3a5   : > { %696 = vst.msk [vmem:[%s327_s29] sm:$0xff] %vm354_vm1, %v695_v2 }
 0x3a6 PF: > { %s19_s30 = sadd.s32 1, %s862_s30  }
 0x3a7   : > { %p16_p4 = scmp.ge.s32.totalorder %s19_s30, 4  }
 0x3a9   :  { %18 = sbr.rel (!%p16_p4) target bundleno = 1 (0x1), region = 86 }

</bundles_post_ra>
